<compile_context>
chip_gen: v6e
topology: v6e:2x2x1
jax: 0.10.0
libtpu: 0.0.40
codegen_flags: <defaults>
</compile_context>

<pallas_src>
import functools

import numpy as np
import jax
import jax.numpy as jnp
from jax.experimental import pallas as pl
from jax.experimental.pallas import tpu as pltpu

EPS = 1e-5
NEG_SLOPE = 0.01


def _round_up(v, m):
    return (v + m - 1) // m * m


# ---------------------------------------------------------------------------
# Fused kernel
# ---------------------------------------------------------------------------
def _make_kernel(H, W, B, Cin_p, Cout_p, num_convs, eps, neg_slope):
    """Build the fused StackedConvResidualBlock kernel for static shapes."""
    HW = H * W
    L = B * HW                      # folded lane axis: B samples x HW pixels
    inv_hw = 1.0 / float(HW)
    taps = [(dy, dx) for dy in (-1, 0, 1) for dx in (-1, 0, 1)]   # t = (dy+1)*3 + (dx+1)

    def kernel(x_ref, wf_ref, wm_ref, wsk_ref, scal_ref, mask_ref, seg_ref, segt_ref,
               o_ref, patches_ref):
        f32 = jnp.float32

        # ---- fold the B samples of this grid step into the lane axis: (Cin_p, B*HW)
        if B == 1:
            x = x_ref[0].astype(f32)
        else:
            x = jnp.concatenate([x_ref[b] for b in range(B)], axis=1).astype(f32)

        seg = seg_ref[...]          # (L, Bp)  one-hot: lane -> sample   (Bp = padded B)
        seg_t = segt_ref[...]       # (Bp, L)  one-hot: sample -> lanes

        def conv3x3(inp, cin, w):
            # One im2col matmul per layer.  Each of the 9 taps is an XLU lane rotation of
            # the folded activation, masked with a precomputed 0/1 boundary multiplier
            # (this IS the zero padding), written straight into the persistent VMEM
            # patches scratch — no per-tap temporaries, no concatenate.
            for t, (dy, dx) in enumerate(taps):
                d = dy * W + dx
                if d == 0:
                    val = inp
                else:
                    val = pltpu.roll(inp, (-d) % L, axis=1) * mask_ref[t:t + 1, :]
                patches_ref[t * cin:(t + 1) * cin, :] = val
            pp = patches_ref[0:9 * cin, :]                         # (9*cin, L)
            return jnp.dot(w, pp, preferred_element_type=f32)      # (Cout_p, L) on the MXU

        def inorm(y, gamma, beta):
            # InstanceNorm2d with per-sample/per-channel stats over the folded lane axis.
            # Segment sums and broadcast-back are tiny MXU matmuls against the constant
            # one-hot matrices -> everything stays lane-dense (no cross-lane reshapes).
            # var = E[y^2] - E[y]^2 (single extra elementwise pass, clamped for safety).
            mean = jnp.dot(y, seg, preferred_element_type=f32) * inv_hw        # (C, Bp)
            msq = jnp.dot(y * y, seg, preferred_element_type=f32) * inv_hw     # (C, Bp)
            var = jnp.maximum(msq - mean * mean, 0.0)
            scale = jax.lax.rsqrt(var + eps) * gamma                           # (C, Bp)
            shift = beta - mean * scale                                        # (C, Bp)
            scale_l = jnp.dot(scale, seg_t, preferred_element_type=f32)        # (C, L)
            shift_l = jnp.dot(shift, seg_t, preferred_element_type=f32)        # (C, L)
            return y * scale_l + shift_l

        def lrelu(y):
            return jnp.where(y >= 0, y, neg_slope * y)

        # NOTE: conv biases are intentionally NOT added — a per-channel constant offset
        # cancels exactly in the InstanceNorm that immediately follows every conv here.

        # ---- main branch, layer 1 (Cin -> Cout): conv + IN + LeakyReLU
        y = conv3x3(x, Cin_p, wf_ref[...].astype(f32))
        y = lrelu(inorm(y, scal_ref[:, 0:1], scal_ref[:, 1:2]))

        # ---- main branch, layers 2..num_convs (Cout -> Cout); last one has nonlin=None
        for li in range(num_convs - 1):
            y = conv3x3(y, Cout_p, wm_ref[li].astype(f32))
            y = inorm(y, scal_ref[:, 2 + 2 * li:3 + 2 * li],
                         scal_ref[:, 3 + 2 * li:4 + 2 * li])
            if li < num_convs - 2:
                y = lrelu(y)

        # ---- skip branch: 1x1 conv (bias=False) + IN
        c0 = 2 * num_convs
        s = jnp.dot(wsk_ref[...].astype(f32), x, preferred_element_type=f32)
        s = inorm(s, scal_ref[:, c0:c0 + 1], scal_ref[:, c0 + 1:c0 + 2])

        # ---- residual add + final activation; un-fold lanes back to per-sample blocks
        r = lrelu(y + s)
        for b in range(B):
            o_ref[b] = r[:, b * HW:(b + 1) * HW].astype(o_ref.dtype)

    return kernel


# ---------------------------------------------------------------------------
# Parameter / constant preparation + wrapper
# ---------------------------------------------------------------------------
def _pack_weights(params, Cin_p, Cout_p):
    """Pad + repack weights into MXU-ready, sublane-aligned pieces (each its own input)."""
    (w1, _b1, g1, bt1), mids, (ws, gs, bs) = params
    Cout, Cin = int(w1.shape[0]), int(w1.shape[1])
    num_convs = 1 + len(mids)

    def pack3x3(w, cin_p):
        cout, cin = int(w.shape[0]), int(w.shape[1])
        w = jnp.transpose(w, (0, 2, 3, 1))                                   # (cout,3,3,cin)
        w = jnp.pad(w, ((0, Cout_p - cout), (0, 0), (0, 0), (0, cin_p - cin)))
        return w.reshape(Cout_p, 9 * cin_p)                                  # col = t*cin_p + c

    wf = pack3x3(w1, Cin_p)                                                  # (Cout_p, 9*Cin_p)
    wm = jnp.stack([pack3x3(w, Cout_p) for (w, _b, _g, _bt) in mids], axis=0)
    wsk = jnp.pad(ws.reshape(Cout, Cin), ((0, Cout_p - Cout), (0, Cin_p - Cin)))

    # Per-channel gamma/beta of every norm, packed into one lane-padded (Cout_p, 128) piece.
    # (Conv biases are omitted: they cancel inside the following InstanceNorm.)
    cols = [g1, bt1]
    for (_w, _b, g, bt) in mids:
        cols += [g, bt]
    cols += [gs, bs]
    assert 2 * num_convs + 2 <= 128
    scal = jnp.stack(cols, axis=1)                                           # (Cout, 2*nc+2)
    scal = jnp.pad(scal, ((0, Cout_p - Cout), (0, 128 - scal.shape[1])))
    return wf, wm, wsk, scal


def _build_constants(H, W, B):
    """Boundary masks (zero padding) and per-sample segment matrices, built once on host."""
    HW = H * W
    L = B * HW
    col = np.arange(L)
    p = col % HW            # per-sample flat pixel index
    hh = p // W
    ww = p % W
    masks = np.zeros((16, L), np.float32)                 # 16 rows: sublane-padded
    t = 0
    for dy in (-1, 0, 1):
        for dx in (-1, 0, 1):
            valid = ((hh + dy >= 0) & (hh + dy < H) & (ww + dx >= 0) & (ww + dx < W))
            masks[t] = valid.astype(np.float32)
            t += 1
    Bp = _round_up(B, 8)                                  # pad the sample dim for clean matmuls
    seg = np.zeros((L, Bp), np.float32)
    seg[np.arange(L), col // HW] = 1.0
    return jnp.asarray(masks), jnp.asarray(seg), jnp.asarray(seg.T)


def _pick_samples_per_step(N, HW, Cin_p, Cout_p):
    """Samples folded into the lane axis per grid step.

    Sized so that double-buffered in/out blocks + the (9*C, B*HW) patches scratch +
    a few live activations stay well inside the 32 MiB scoped-VMEM default (which also
    leaves headroom for v7x's smaller 64 MiB physical VMEM), while targeting a few
    thousand lanes so per-step pipeline overhead and the MXU N-dim are amortized.
    Keeps >= 2 grid steps when N allows so both v7x TensorCores get work under
    dimension_semantics=("parallel",).
    """
    cmax = max(Cin_p, Cout_p)
    bytes_per_sample = 4 * HW * (4 * Cin_p + 4 * Cout_p + 9 * cmax + 6 * cmax)
    b = max(1, (24 * 1024 * 1024) // max(1, bytes_per_sample))   # VMEM budget
    b = min(b, max(1, 4096 // HW))                               # ~4K lanes per step is plenty
    if N >= 2:
        b = min(b, (N + 1) // 2)                                 # keep >= 2 grid steps
    return max(1, min(b, N))


def stacked_conv_residual_block(x_nchw, params, *, samples_per_step=None,
                                eps=EPS, neg_slope=NEG_SLOPE):
    """Forward pass of StackedConvResidualBlock.  Input/output in NCHW (PyTorch layout)."""
    (w1, _, _, _), mids, _ = params
    assert len(mids) >= 1, "num_convs must be > 1"
    N, Cin, H, W = (int(d) for d in x_nchw.shape)
    Cout = int(w1.shape[0])
    num_convs = 1 + len(mids)
    HW = H * W
    Cin_p, Cout_p = _round_up(Cin, 8), _round_up(Cout, 8)

    B = samples_per_step if samples_per_step is not None else \
        _pick_samples_per_step(N, HW, Cin_p, Cout_p)
    B = int(max(1, min(B, N)))
    G = -(-N // B)                       # grid steps
    N_pad = G * B
    L = B * HW

    # Channel padding to full sublane groups; batch padding so B divides the batch.
    x_flat = x_nchw.reshape(N, Cin, HW)
    x_flat = jnp.pad(x_flat, ((0, N_pad - N), (0, Cin_p - Cin), (0, 0)))

    wf, wm, wsk, scal = _pack_weights(params, Cin_p, Cout_p)
    masks, seg, seg_t = _build_constants(H, W, B)
    Bp = int(seg.shape[1])
    cmax = max(Cin_p, Cout_p)

    kernel = _make_kernel(H, W, B, Cin_p, Cout_p, num_convs, eps, neg_slope)

    out = pl.pallas_call(
        kernel,
        out_shape=jax.ShapeDtypeStruct((N_pad, Cout_p, HW), x_nchw.dtype),
        grid_spec=pltpu.PrefetchScalarGridSpec(
            num_scalar_prefetch=0,
            grid=(G,),
            in_specs=[
                pl.BlockSpec((B, Cin_p, HW), lambda g: (g, 0, 0)),                # activations
                pl.BlockSpec((Cout_p, 9 * Cin_p), lambda g: (0, 0)),              # conv1 weight
                pl.BlockSpec((num_convs - 1, Cout_p, 9 * Cout_p),
                             lambda g: (0, 0, 0)),                                # mid conv weights
                pl.BlockSpec((Cout_p, Cin_p), lambda g: (0, 0)),                  # skip 1x1 weight
                pl.BlockSpec((Cout_p, 128), lambda g: (0, 0)),                    # IN gamma/beta
                pl.BlockSpec((16, L), lambda g: (0, 0)),                          # boundary masks
                pl.BlockSpec((L, Bp), lambda g: (0, 0)),                          # lane -> sample
                pl.BlockSpec((Bp, L), lambda g: (0, 0)),                          # sample -> lanes
            ],
            out_specs=pl.BlockSpec((B, Cout_p, HW), lambda g: (g, 0, 0)),
            scratch_shapes=[pltpu.VMEM((9 * cmax, L), jnp.float32)],              # im2col patches
        ),
        compiler_params=pltpu.CompilerParams(
            dimension_semantics=("parallel",)),      # batch steps across TensorCores on v7x
    )(x_flat, wf, wm, wsk, scal, masks, seg, seg_t)

    return out[:N, :Cout, :].reshape(N, Cout, H, W)


# ---------------------------------------------------------------------------
# Deterministic init + pure-JAX reference (correctness cross-check)
# ---------------------------------------------------------------------------
def init_params(key, input_channels, output_channels, num_convs):
    assert num_convs > 1
    keys = jax.random.split(key, num_convs + 1)

    def conv_layer(k, cin, cout):
        kw, kb, kg, kbt = jax.random.split(k, 4)
        w = jax.random.normal(kw, (cout, cin, 3, 3), jnp.float32) / jnp.sqrt(cin * 9.0)
        b = 0.01 * jax.random.normal(kb, (cout,), jnp.float32)
        g = 1.0 + 0.1 * jax.random.normal(kg, (cout,), jnp.float32)
        bt = 0.1 * jax.random.normal(kbt, (cout,), jnp.float32)
        return w, b, g, bt

    first = conv_layer(keys[0], input_channels, output_channels)
    mids = tuple(conv_layer(keys[1 + i], output_channels, output_channels)
                 for i in range(num_convs - 1))
    ksw, ksg, ksb = jax.random.split(keys[num_convs], 3)
    ws = (jax.random.normal(ksw, (output_channels, input_channels, 1, 1), jnp.float32)
          / jnp.sqrt(float(input_channels)))
    gs = 1.0 + 0.1 * jax.random.normal(ksg, (output_channels,), jnp.float32)
    bs = 0.1 * jax.random.normal(ksb, (output_channels,), jnp.float32)
    return first, mids, (ws, gs, bs)


def reference_forward(x, params, eps=EPS, neg_slope=NEG_SLOPE):
    """Pure-JAX/XLA reference of the module forward (NCHW), biases included."""
    (w1, b1, g1, bt1), mids, (ws, gs, bs) = params

    def conv(inp, w, pad):
        return jax.lax.conv_general_dilated(
            inp, w, window_strides=(1, 1), padding=pad,
            dimension_numbers=("NCHW", "OIHW", "NCHW"),
            precision=jax.lax.Precision.HIGHEST)

    def inorm(y, g, b):
        mean = jnp.mean(y, axis=(2, 3), keepdims=True)
        var = jnp.mean(jnp.square(y - mean), axis=(2, 3), keepdims=True)
        return ((y - mean) * jax.lax.rsqrt(var + eps)
                * g[None, :, None, None] + b[None, :, None, None])

    def lrelu(y):
        return jnp.where(y >= 0, y, neg_slope * y)

    y = conv(x, w1, ((1, 1), (1, 1))) + b1[None, :, None, None]
    y = lrelu(inorm(y, g1, bt1))
    for li, (w, b, g, bt) in enumerate(mids):
        y = conv(y, w, ((1, 1), (1, 1))) + b[None, :, None, None]
        y = inorm(y, g, bt)
        if li < len(mids) - 1:
            y = lrelu(y)
    s = inorm(conv(x, ws, ((0, 0), (0, 0))), gs, bs)
    return lrelu(y + s)


# ---------------------------------------------------------------------------
if __name__ == "__main__":
    N, Cin, H, W = 2, 4, 16, 16
    Cout = 8
    num_convs = 2          # module asserts num_convs > 1

    key = jax.random.PRNGKey(0)
    k_x, k_p = jax.random.split(key)
    x = jax.random.normal(k_x, (N, Cin, H, W), jnp.float32)    # NCHW, like PyTorch
    params = init_params(k_p, Cin, Cout, num_convs)

    ref = reference_forward(x, params)

    # Two configurations: the auto heuristic (1 sample/step -> 2 "parallel" grid steps,
    # keeps both v7x TensorCores busy) and an explicitly folded one (2 samples/step,
    # exercises the lane-folded batch + per-sample InstanceNorm path).
    for spp in (None, 2):
        fwd = jax.jit(functools.partial(stacked_conv_residual_block,
                                        samples_per_step=spp))
        out = jax.block_until_ready(fwd(x, params))
        assert out.shape == (N, Cout, H, W), out.shape
        assert bool(jnp.all(jnp.isfinite(out)))
        diff = out - ref
        rel_l2 = float(jnp.sqrt(jnp.sum(diff * diff)) /
                       (jnp.sqrt(jnp.sum(ref * ref)) + 1e-12))
        max_abs = float(jnp.max(jnp.abs(diff)))
        # Loose tolerance: MXU default precision on the conv / stat matmuls.
        assert rel_l2 < 5e-2 and max_abs < 2.5e-1, (spp, rel_l2, max_abs)

    print("KERNEL_OK")
</pallas_src>

<mosaic_0001>
module attributes {stable_mosaic.version = 11 : i64} {
  func.func @kernel(%arg0: i32, %arg1: memref<1x8x256xf32, #tpu.memory_space<vmem>>, %arg2: memref<8x72xf32, #tpu.memory_space<vmem>>, %arg3: memref<1x8x72xf32, #tpu.memory_space<vmem>>, %arg4: memref<8x8xf32, #tpu.memory_space<vmem>>, %arg5: memref<8x128xf32, #tpu.memory_space<vmem>>, %arg6: memref<16x256xf32, #tpu.memory_space<vmem>>, %arg7: memref<256x8xf32, #tpu.memory_space<vmem>>, %arg8: memref<8x256xf32, #tpu.memory_space<vmem>>, %arg9: memref<1x8x256xf32, #tpu.memory_space<vmem>>, %arg10: memref<72x256xf32, #tpu.memory_space<vmem>>) attributes {dimension_semantics = [#tpu.dimension_semantics<parallel>], iteration_bounds = array<i64: 2>, scalar_prefetch = 0 : i64, scratch_operands = 1 : i64, tpu.core_type = #tpu.core_type<tc>, window_params = [{transform_indices = @transform_0, window_bounds = array<i64: 1, 8, 256>}, {pipeline_mode = #tpu.pipeline_mode<synchronous>, transform_indices = @transform_1, window_bounds = array<i64: 8, 72>}, {pipeline_mode = #tpu.pipeline_mode<synchronous>, transform_indices = @transform_2, window_bounds = array<i64: 1, 8, 72>}, {pipeline_mode = #tpu.pipeline_mode<synchronous>, transform_indices = @transform_3, window_bounds = array<i64: 8, 8>}, {pipeline_mode = #tpu.pipeline_mode<synchronous>, transform_indices = @transform_4, window_bounds = array<i64: 8, 128>}, {pipeline_mode = #tpu.pipeline_mode<synchronous>, transform_indices = @transform_5, window_bounds = array<i64: 16, 256>}, {pipeline_mode = #tpu.pipeline_mode<synchronous>, transform_indices = @transform_6, window_bounds = array<i64: 256, 8>}, {pipeline_mode = #tpu.pipeline_mode<synchronous>, transform_indices = @transform_7, window_bounds = array<i64: 8, 256>}, {transform_indices = @transform_8, window_bounds = array<i64: 1, 8, 256>}]} {
    %c0 = arith.constant 0 : index
    %c0_0 = arith.constant 0 : index
    %c0_1 = arith.constant 0 : index
    %0 = vector.load %arg1[%c0, %c0_0, %c0_1] : memref<1x8x256xf32, #tpu.memory_space<vmem>>, vector<1x8x256xf32>
    %1 = vector.shape_cast %0 : vector<1x8x256xf32> to vector<8x256xf32>
    %c0_2 = arith.constant 0 : index
    %c0_3 = arith.constant 0 : index
    %2 = vector.load %arg7[%c0_2, %c0_3] : memref<256x8xf32, #tpu.memory_space<vmem>>, vector<256x8xf32>
    %c0_4 = arith.constant 0 : index
    %c0_5 = arith.constant 0 : index
    %3 = vector.load %arg8[%c0_4, %c0_5] : memref<8x256xf32, #tpu.memory_space<vmem>>, vector<8x256xf32>
    %c0_6 = arith.constant 0 : index
    %c0_7 = arith.constant 0 : index
    %4 = vector.load %arg2[%c0_6, %c0_7] : memref<8x72xf32, #tpu.memory_space<vmem>>, vector<8x72xf32>
    %c17_i32 = arith.constant 17 : i32
    %5 = tpu.dynamic_rotate %1 by %c17_i32 dim 1 : vector<8x256xf32>, i32 -> vector<8x256xf32>
    %c0_8 = arith.constant 0 : index
    %c0_9 = arith.constant 0 : index
    %6 = vector.load %arg6[%c0_8, %c0_9] : memref<16x256xf32, #tpu.memory_space<vmem>>, vector<1x256xf32>
    %7 = vector.broadcast %6 : vector<1x256xf32> to vector<8x256xf32>
    %8 = arith.mulf %5, %7 : vector<8x256xf32>
    %c0_10 = arith.constant 0 : index
    %c0_11 = arith.constant 0 : index
    %9 = vector.load %arg10[%c0_10, %c0_11] : memref<72x256xf32, #tpu.memory_space<vmem>>, vector<8x256xf32>
    tpu.vector_store %arg10[%c0_10, %c0_11], %8 {strides = array<i32>} : memref<72x256xf32, #tpu.memory_space<vmem>>, vector<8x256xf32>,
    %c16_i32 = arith.constant 16 : i32
    %10 = tpu.dynamic_rotate %1 by %c16_i32 dim 1 : vector<8x256xf32>, i32 -> vector<8x256xf32>
    %c1 = arith.constant 1 : index
    %c0_12 = arith.constant 0 : index
    %11 = vector.load %arg6[%c1, %c0_12] : memref<16x256xf32, #tpu.memory_space<vmem>>, vector<1x256xf32>
    %12 = vector.broadcast %11 : vector<1x256xf32> to vector<8x256xf32>
    %13 = arith.mulf %10, %12 : vector<8x256xf32>
    %c8 = arith.constant 8 : index
    %c0_13 = arith.constant 0 : index
    %14 = vector.load %arg10[%c8, %c0_13] : memref<72x256xf32, #tpu.memory_space<vmem>>, vector<8x256xf32>
    tpu.vector_store %arg10[%c8, %c0_13], %13 {strides = array<i32>} : memref<72x256xf32, #tpu.memory_space<vmem>>, vector<8x256xf32>,
    %c15_i32 = arith.constant 15 : i32
    %15 = tpu.dynamic_rotate %1 by %c15_i32 dim 1 : vector<8x256xf32>, i32 -> vector<8x256xf32>
    %c2 = arith.constant 2 : index
    %c0_14 = arith.constant 0 : index
    %16 = vector.load %arg6[%c2, %c0_14] : memref<16x256xf32, #tpu.memory_space<vmem>>, vector<1x256xf32>
    %17 = vector.broadcast %16 : vector<1x256xf32> to vector<8x256xf32>
    %18 = arith.mulf %15, %17 : vector<8x256xf32>
    %c16 = arith.constant 16 : index
    %c0_15 = arith.constant 0 : index
    %19 = vector.load %arg10[%c16, %c0_15] : memref<72x256xf32, #tpu.memory_space<vmem>>, vector<8x256xf32>
    tpu.vector_store %arg10[%c16, %c0_15], %18 {strides = array<i32>} : memref<72x256xf32, #tpu.memory_space<vmem>>, vector<8x256xf32>,
    %c1_i32 = arith.constant 1 : i32
    %20 = tpu.dynamic_rotate %1 by %c1_i32 dim 1 : vector<8x256xf32>, i32 -> vector<8x256xf32>
    %c3 = arith.constant 3 : index
    %c0_16 = arith.constant 0 : index
    %21 = vector.load %arg6[%c3, %c0_16] : memref<16x256xf32, #tpu.memory_space<vmem>>, vector<1x256xf32>
    %22 = vector.broadcast %21 : vector<1x256xf32> to vector<8x256xf32>
    %23 = arith.mulf %20, %22 : vector<8x256xf32>
    %c24 = arith.constant 24 : index
    %c0_17 = arith.constant 0 : index
    %24 = vector.load %arg10[%c24, %c0_17] : memref<72x256xf32, #tpu.memory_space<vmem>>, vector<8x256xf32>
    tpu.vector_store %arg10[%c24, %c0_17], %23 {strides = array<i32>} : memref<72x256xf32, #tpu.memory_space<vmem>>, vector<8x256xf32>,
    %c32 = arith.constant 32 : index
    %c0_18 = arith.constant 0 : index
    %25 = vector.load %arg10[%c32, %c0_18] : memref<72x256xf32, #tpu.memory_space<vmem>>, vector<8x256xf32>
    tpu.vector_store %arg10[%c32, %c0_18], %1 {strides = array<i32>} : memref<72x256xf32, #tpu.memory_space<vmem>>, vector<8x256xf32>,
    %c255_i32 = arith.constant 255 : i32
    %26 = tpu.dynamic_rotate %1 by %c255_i32 dim 1 : vector<8x256xf32>, i32 -> vector<8x256xf32>
    %c5 = arith.constant 5 : index
    %c0_19 = arith.constant 0 : index
    %27 = vector.load %arg6[%c5, %c0_19] : memref<16x256xf32, #tpu.memory_space<vmem>>, vector<1x256xf32>
    %28 = vector.broadcast %27 : vector<1x256xf32> to vector<8x256xf32>
    %29 = arith.mulf %26, %28 : vector<8x256xf32>
    %c40 = arith.constant 40 : index
    %c0_20 = arith.constant 0 : index
    %30 = vector.load %arg10[%c40, %c0_20] : memref<72x256xf32, #tpu.memory_space<vmem>>, vector<8x256xf32>
    tpu.vector_store %arg10[%c40, %c0_20], %29 {strides = array<i32>} : memref<72x256xf32, #tpu.memory_space<vmem>>, vector<8x256xf32>,
    %c241_i32 = arith.constant 241 : i32
    %31 = tpu.dynamic_rotate %1 by %c241_i32 dim 1 : vector<8x256xf32>, i32 -> vector<8x256xf32>
    %c6 = arith.constant 6 : index
    %c0_21 = arith.constant 0 : index
    %32 = vector.load %arg6[%c6, %c0_21] : memref<16x256xf32, #tpu.memory_space<vmem>>, vector<1x256xf32>
    %33 = vector.broadcast %32 : vector<1x256xf32> to vector<8x256xf32>
    %34 = arith.mulf %31, %33 : vector<8x256xf32>
    %c48 = arith.constant 48 : index
    %c0_22 = arith.constant 0 : index
    %35 = vector.load %arg10[%c48, %c0_22] : memref<72x256xf32, #tpu.memory_space<vmem>>, vector<8x256xf32>
    tpu.vector_store %arg10[%c48, %c0_22], %34 {strides = array<i32>} : memref<72x256xf32, #tpu.memory_space<vmem>>, vector<8x256xf32>,
    %c240_i32 = arith.constant 240 : i32
    %36 = tpu.dynamic_rotate %1 by %c240_i32 dim 1 : vector<8x256xf32>, i32 -> vector<8x256xf32>
    %c7 = arith.constant 7 : index
    %c0_23 = arith.constant 0 : index
    %37 = vector.load %arg6[%c7, %c0_23] : memref<16x256xf32, #tpu.memory_space<vmem>>, vector<1x256xf32>
    %38 = vector.broadcast %37 : vector<1x256xf32> to vector<8x256xf32>
    %39 = arith.mulf %36, %38 : vector<8x256xf32>
    %c56 = arith.constant 56 : index
    %c0_24 = arith.constant 0 : index
    %40 = vector.load %arg10[%c56, %c0_24] : memref<72x256xf32, #tpu.memory_space<vmem>>, vector<8x256xf32>
    tpu.vector_store %arg10[%c56, %c0_24], %39 {strides = array<i32>} : memref<72x256xf32, #tpu.memory_space<vmem>>, vector<8x256xf32>,
    %c239_i32 = arith.constant 239 : i32
    %41 = tpu.dynamic_rotate %1 by %c239_i32 dim 1 : vector<8x256xf32>, i32 -> vector<8x256xf32>
    %c8_25 = arith.constant 8 : index
    %c0_26 = arith.constant 0 : index
    %42 = vector.load %arg6[%c8_25, %c0_26] : memref<16x256xf32, #tpu.memory_space<vmem>>, vector<1x256xf32>
    %43 = vector.broadcast %42 : vector<1x256xf32> to vector<8x256xf32>
    %44 = arith.mulf %41, %43 : vector<8x256xf32>
    %c64 = arith.constant 64 : index
    %c0_27 = arith.constant 0 : index
    %45 = vector.load %arg10[%c64, %c0_27] : memref<72x256xf32, #tpu.memory_space<vmem>>, vector<8x256xf32>
    tpu.vector_store %arg10[%c64, %c0_27], %44 {strides = array<i32>} : memref<72x256xf32, #tpu.memory_space<vmem>>, vector<8x256xf32>,
    %c0_28 = arith.constant 0 : index
    %c0_29 = arith.constant 0 : index
    %46 = vector.load %arg10[%c0_28, %c0_29] : memref<72x256xf32, #tpu.memory_space<vmem>>, vector<72x256xf32>
    %cst = arith.constant dense<0.000000e+00> : vector<8x256xf32>
    %47 = tpu.matmul %4, %46, %cst {dimension_numbers = #tpu.dot_dimension_numbers<[1], [0], [0], [1], [0, 0, 1, 1], [], []>} : vector<8x72xf32>, vector<72x256xf32>, vector<8x256xf32> -> vector<8x256xf32>
    %c0_30 = arith.constant 0 : index
    %c0_31 = arith.constant 0 : index
    %48 = vector.load %arg5[%c0_30, %c0_31] : memref<8x128xf32, #tpu.memory_space<vmem>>, vector<8x1xf32>
    %c0_32 = arith.constant 0 : index
    %c1_33 = arith.constant 1 : index
    %49 = vector.load %arg5[%c0_32, %c1_33] : memref<8x128xf32, #tpu.memory_space<vmem>>, vector<8x1xf32>
    %cst_34 = arith.constant dense<0.000000e+00> : vector<8x8xf32>
    %50 = tpu.matmul %47, %2, %cst_34 {dimension_numbers = #tpu.dot_dimension_numbers<[1], [0], [0], [1], [0, 0, 1, 1], [], []>} : vector<8x256xf32>, vector<256x8xf32>, vector<8x8xf32> -> vector<8x8xf32>
    %cst_35 = arith.constant 3.906250e-03 : f32
    %51 = vector.broadcast %cst_35 : f32 to vector<8x8xf32>
    %52 = arith.mulf %50, %51 : vector<8x8xf32>
    %53 = arith.mulf %47, %47 : vector<8x256xf32>
    %cst_36 = arith.constant dense<0.000000e+00> : vector<8x8xf32>
    %54 = tpu.matmul %53, %2, %cst_36 {dimension_numbers = #tpu.dot_dimension_numbers<[1], [0], [0], [1], [0, 0, 1, 1], [], []>} : vector<8x256xf32>, vector<256x8xf32>, vector<8x8xf32> -> vector<8x8xf32>
    %cst_37 = arith.constant 3.906250e-03 : f32
    %55 = vector.broadcast %cst_37 : f32 to vector<8x8xf32>
    %56 = arith.mulf %54, %55 : vector<8x8xf32>
    %57 = arith.mulf %52, %52 : vector<8x8xf32>
    %58 = arith.subf %56, %57 : vector<8x8xf32>
    %cst_38 = arith.constant 0.000000e+00 : f32
    %59 = vector.broadcast %cst_38 : f32 to vector<8x8xf32>
    %60 = arith.maximumf %58, %59 : vector<8x8xf32>
    %cst_39 = arith.constant 9.99999974E-6 : f32
    %61 = vector.broadcast %cst_39 : f32 to vector<8x8xf32>
    %62 = arith.addf %60, %61 : vector<8x8xf32>
    %63 = math.rsqrt %62 : vector<8x8xf32>
    %64 = vector.broadcast %48 : vector<8x1xf32> to vector<8x8xf32>
    %65 = arith.mulf %63, %64 : vector<8x8xf32>
    %66 = arith.mulf %52, %65 : vector<8x8xf32>
    %67 = vector.broadcast %49 : vector<8x1xf32> to vector<8x8xf32>
    %68 = arith.subf %67, %66 : vector<8x8xf32>
    %cst_40 = arith.constant dense<0.000000e+00> : vector<8x256xf32>
    %69 = tpu.matmul %65, %3, %cst_40 {dimension_numbers = #tpu.dot_dimension_numbers<[1], [0], [0], [1], [0, 0, 1, 1], [], []>} : vector<8x8xf32>, vector<8x256xf32>, vector<8x256xf32> -> vector<8x256xf32>
    %cst_41 = arith.constant dense<0.000000e+00> : vector<8x256xf32>
    %70 = tpu.matmul %68, %3, %cst_41 {dimension_numbers = #tpu.dot_dimension_numbers<[1], [0], [0], [1], [0, 0, 1, 1], [], []>} : vector<8x8xf32>, vector<8x256xf32>, vector<8x256xf32> -> vector<8x256xf32>
    %71 = arith.mulf %47, %69 : vector<8x256xf32>
    %72 = arith.addf %71, %70 : vector<8x256xf32>
    %cst_42 = arith.constant 0.000000e+00 : f32
    %73 = vector.broadcast %cst_42 : f32 to vector<8x256xf32>
    %74 = arith.cmpf oge, %72, %73 : vector<8x256xf32>
    %cst_43 = arith.constant 0.00999999977 : f32
    %75 = vector.broadcast %cst_43 : f32 to vector<8x256xf32>
    %76 = arith.mulf %75, %72 : vector<8x256xf32>
    %77 = arith.select %74, %72, %76 : vector<8x256xi1>, vector<8x256xf32>
    %c0_44 = arith.constant 0 : index
    %c0_45 = arith.constant 0 : index
    %c0_46 = arith.constant 0 : index
    %78 = vector.load %arg3[%c0_44, %c0_45, %c0_46] : memref<1x8x72xf32, #tpu.memory_space<vmem>>, vector<1x8x72xf32>
    %79 = vector.shape_cast %78 : vector<1x8x72xf32> to vector<8x72xf32>
    %c17_i32_47 = arith.constant 17 : i32
    %80 = tpu.dynamic_rotate %77 by %c17_i32_47 dim 1 : vector<8x256xf32>, i32 -> vector<8x256xf32>
    %c0_48 = arith.constant 0 : index
    %c0_49 = arith.constant 0 : index
    %81 = vector.load %arg6[%c0_48, %c0_49] : memref<16x256xf32, #tpu.memory_space<vmem>>, vector<1x256xf32>
    %82 = vector.broadcast %81 : vector<1x256xf32> to vector<8x256xf32>
    %83 = arith.mulf %80, %82 : vector<8x256xf32>
    %c0_50 = arith.constant 0 : index
    %c0_51 = arith.constant 0 : index
    %84 = vector.load %arg10[%c0_50, %c0_51] : memref<72x256xf32, #tpu.memory_space<vmem>>, vector<8x256xf32>
    tpu.vector_store %arg10[%c0_50, %c0_51], %83 {strides = array<i32>} : memref<72x256xf32, #tpu.memory_space<vmem>>, vector<8x256xf32>,
    %c16_i32_52 = arith.constant 16 : i32
    %85 = tpu.dynamic_rotate %77 by %c16_i32_52 dim 1 : vector<8x256xf32>, i32 -> vector<8x256xf32>
    %c1_53 = arith.constant 1 : index
    %c0_54 = arith.constant 0 : index
    %86 = vector.load %arg6[%c1_53, %c0_54] : memref<16x256xf32, #tpu.memory_space<vmem>>, vector<1x256xf32>
    %87 = vector.broadcast %86 : vector<1x256xf32> to vector<8x256xf32>
    %88 = arith.mulf %85, %87 : vector<8x256xf32>
    %c8_55 = arith.constant 8 : index
    %c0_56 = arith.constant 0 : index
    %89 = vector.load %arg10[%c8_55, %c0_56] : memref<72x256xf32, #tpu.memory_space<vmem>>, vector<8x256xf32>
    tpu.vector_store %arg10[%c8_55, %c0_56], %88 {strides = array<i32>} : memref<72x256xf32, #tpu.memory_space<vmem>>, vector<8x256xf32>,
    %c15_i32_57 = arith.constant 15 : i32
    %90 = tpu.dynamic_rotate %77 by %c15_i32_57 dim 1 : vector<8x256xf32>, i32 -> vector<8x256xf32>
    %c2_58 = arith.constant 2 : index
    %c0_59 = arith.constant 0 : index
    %91 = vector.load %arg6[%c2_58, %c0_59] : memref<16x256xf32, #tpu.memory_space<vmem>>, vector<1x256xf32>
    %92 = vector.broadcast %91 : vector<1x256xf32> to vector<8x256xf32>
    %93 = arith.mulf %90, %92 : vector<8x256xf32>
    %c16_60 = arith.constant 16 : index
    %c0_61 = arith.constant 0 : index
    %94 = vector.load %arg10[%c16_60, %c0_61] : memref<72x256xf32, #tpu.memory_space<vmem>>, vector<8x256xf32>
    tpu.vector_store %arg10[%c16_60, %c0_61], %93 {strides = array<i32>} : memref<72x256xf32, #tpu.memory_space<vmem>>, vector<8x256xf32>,
    %c1_i32_62 = arith.constant 1 : i32
    %95 = tpu.dynamic_rotate %77 by %c1_i32_62 dim 1 : vector<8x256xf32>, i32 -> vector<8x256xf32>
    %c3_63 = arith.constant 3 : index
    %c0_64 = arith.constant 0 : index
    %96 = vector.load %arg6[%c3_63, %c0_64] : memref<16x256xf32, #tpu.memory_space<vmem>>, vector<1x256xf32>
    %97 = vector.broadcast %96 : vector<1x256xf32> to vector<8x256xf32>
    %98 = arith.mulf %95, %97 : vector<8x256xf32>
    %c24_65 = arith.constant 24 : index
    %c0_66 = arith.constant 0 : index
    %99 = vector.load %arg10[%c24_65, %c0_66] : memref<72x256xf32, #tpu.memory_space<vmem>>, vector<8x256xf32>
    tpu.vector_store %arg10[%c24_65, %c0_66], %98 {strides = array<i32>} : memref<72x256xf32, #tpu.memory_space<vmem>>, vector<8x256xf32>,
    %c32_67 = arith.constant 32 : index
    %c0_68 = arith.constant 0 : index
    %100 = vector.load %arg10[%c32_67, %c0_68] : memref<72x256xf32, #tpu.memory_space<vmem>>, vector<8x256xf32>
    tpu.vector_store %arg10[%c32_67, %c0_68], %77 {strides = array<i32>} : memref<72x256xf32, #tpu.memory_space<vmem>>, vector<8x256xf32>,
    %c255_i32_69 = arith.constant 255 : i32
    %101 = tpu.dynamic_rotate %77 by %c255_i32_69 dim 1 : vector<8x256xf32>, i32 -> vector<8x256xf32>
    %c5_70 = arith.constant 5 : index
    %c0_71 = arith.constant 0 : index
    %102 = vector.load %arg6[%c5_70, %c0_71] : memref<16x256xf32, #tpu.memory_space<vmem>>, vector<1x256xf32>
    %103 = vector.broadcast %102 : vector<1x256xf32> to vector<8x256xf32>
    %104 = arith.mulf %101, %103 : vector<8x256xf32>
    %c40_72 = arith.constant 40 : index
    %c0_73 = arith.constant 0 : index
    %105 = vector.load %arg10[%c40_72, %c0_73] : memref<72x256xf32, #tpu.memory_space<vmem>>, vector<8x256xf32>
    tpu.vector_store %arg10[%c40_72, %c0_73], %104 {strides = array<i32>} : memref<72x256xf32, #tpu.memory_space<vmem>>, vector<8x256xf32>,
    %c241_i32_74 = arith.constant 241 : i32
    %106 = tpu.dynamic_rotate %77 by %c241_i32_74 dim 1 : vector<8x256xf32>, i32 -> vector<8x256xf32>
    %c6_75 = arith.constant 6 : index
    %c0_76 = arith.constant 0 : index
    %107 = vector.load %arg6[%c6_75, %c0_76] : memref<16x256xf32, #tpu.memory_space<vmem>>, vector<1x256xf32>
    %108 = vector.broadcast %107 : vector<1x256xf32> to vector<8x256xf32>
    %109 = arith.mulf %106, %108 : vector<8x256xf32>
    %c48_77 = arith.constant 48 : index
    %c0_78 = arith.constant 0 : index
    %110 = vector.load %arg10[%c48_77, %c0_78] : memref<72x256xf32, #tpu.memory_space<vmem>>, vector<8x256xf32>
    tpu.vector_store %arg10[%c48_77, %c0_78], %109 {strides = array<i32>} : memref<72x256xf32, #tpu.memory_space<vmem>>, vector<8x256xf32>,
    %c240_i32_79 = arith.constant 240 : i32
    %111 = tpu.dynamic_rotate %77 by %c240_i32_79 dim 1 : vector<8x256xf32>, i32 -> vector<8x256xf32>
    %c7_80 = arith.constant 7 : index
    %c0_81 = arith.constant 0 : index
    %112 = vector.load %arg6[%c7_80, %c0_81] : memref<16x256xf32, #tpu.memory_space<vmem>>, vector<1x256xf32>
    %113 = vector.broadcast %112 : vector<1x256xf32> to vector<8x256xf32>
    %114 = arith.mulf %111, %113 : vector<8x256xf32>
    %c56_82 = arith.constant 56 : index
    %c0_83 = arith.constant 0 : index
    %115 = vector.load %arg10[%c56_82, %c0_83] : memref<72x256xf32, #tpu.memory_space<vmem>>, vector<8x256xf32>
    tpu.vector_store %arg10[%c56_82, %c0_83], %114 {strides = array<i32>} : memref<72x256xf32, #tpu.memory_space<vmem>>, vector<8x256xf32>,
    %c239_i32_84 = arith.constant 239 : i32
    %116 = tpu.dynamic_rotate %77 by %c239_i32_84 dim 1 : vector<8x256xf32>, i32 -> vector<8x256xf32>
    %c8_85 = arith.constant 8 : index
    %c0_86 = arith.constant 0 : index
    %117 = vector.load %arg6[%c8_85, %c0_86] : memref<16x256xf32, #tpu.memory_space<vmem>>, vector<1x256xf32>
    %118 = vector.broadcast %117 : vector<1x256xf32> to vector<8x256xf32>
    %119 = arith.mulf %116, %118 : vector<8x256xf32>
    %c64_87 = arith.constant 64 : index
    %c0_88 = arith.constant 0 : index
    %120 = vector.load %arg10[%c64_87, %c0_88] : memref<72x256xf32, #tpu.memory_space<vmem>>, vector<8x256xf32>
    tpu.vector_store %arg10[%c64_87, %c0_88], %119 {strides = array<i32>} : memref<72x256xf32, #tpu.memory_space<vmem>>, vector<8x256xf32>,
    %c0_89 = arith.constant 0 : index
    %c0_90 = arith.constant 0 : index
    %121 = vector.load %arg10[%c0_89, %c0_90] : memref<72x256xf32, #tpu.memory_space<vmem>>, vector<72x256xf32>
    %cst_91 = arith.constant dense<0.000000e+00> : vector<8x256xf32>
    %122 = tpu.matmul %79, %121, %cst_91 {dimension_numbers = #tpu.dot_dimension_numbers<[1], [0], [0], [1], [0, 0, 1, 1], [], []>} : vector<8x72xf32>, vector<72x256xf32>, vector<8x256xf32> -> vector<8x256xf32>
    %c0_92 = arith.constant 0 : index
    %c2_93 = arith.constant 2 : index
    %123 = vector.load %arg5[%c0_92, %c2_93] : memref<8x128xf32, #tpu.memory_space<vmem>>, vector<8x1xf32>
    %c0_94 = arith.constant 0 : index
    %c3_95 = arith.constant 3 : index
    %124 = vector.load %arg5[%c0_94, %c3_95] : memref<8x128xf32, #tpu.memory_space<vmem>>, vector<8x1xf32>
    %cst_96 = arith.constant dense<0.000000e+00> : vector<8x8xf32>
    %125 = tpu.matmul %122, %2, %cst_96 {dimension_numbers = #tpu.dot_dimension_numbers<[1], [0], [0], [1], [0, 0, 1, 1], [], []>} : vector<8x256xf32>, vector<256x8xf32>, vector<8x8xf32> -> vector<8x8xf32>
    %cst_97 = arith.constant 3.906250e-03 : f32
    %126 = vector.broadcast %cst_97 : f32 to vector<8x8xf32>
    %127 = arith.mulf %125, %126 : vector<8x8xf32>
    %128 = arith.mulf %122, %122 : vector<8x256xf32>
    %cst_98 = arith.constant dense<0.000000e+00> : vector<8x8xf32>
    %129 = tpu.matmul %128, %2, %cst_98 {dimension_numbers = #tpu.dot_dimension_numbers<[1], [0], [0], [1], [0, 0, 1, 1], [], []>} : vector<8x256xf32>, vector<256x8xf32>, vector<8x8xf32> -> vector<8x8xf32>
    %cst_99 = arith.constant 3.906250e-03 : f32
    %130 = vector.broadcast %cst_99 : f32 to vector<8x8xf32>
    %131 = arith.mulf %129, %130 : vector<8x8xf32>
    %132 = arith.mulf %127, %127 : vector<8x8xf32>
    %133 = arith.subf %131, %132 : vector<8x8xf32>
    %cst_100 = arith.constant 0.000000e+00 : f32
    %134 = vector.broadcast %cst_100 : f32 to vector<8x8xf32>
    %135 = arith.maximumf %133, %134 : vector<8x8xf32>
    %cst_101 = arith.constant 9.99999974E-6 : f32
    %136 = vector.broadcast %cst_101 : f32 to vector<8x8xf32>
    %137 = arith.addf %135, %136 : vector<8x8xf32>
    %138 = math.rsqrt %137 : vector<8x8xf32>
    %139 = vector.broadcast %123 : vector<8x1xf32> to vector<8x8xf32>
    %140 = arith.mulf %138, %139 : vector<8x8xf32>
    %141 = arith.mulf %127, %140 : vector<8x8xf32>
    %142 = vector.broadcast %124 : vector<8x1xf32> to vector<8x8xf32>
    %143 = arith.subf %142, %141 : vector<8x8xf32>
    %cst_102 = arith.constant dense<0.000000e+00> : vector<8x256xf32>
    %144 = tpu.matmul %140, %3, %cst_102 {dimension_numbers = #tpu.dot_dimension_numbers<[1], [0], [0], [1], [0, 0, 1, 1], [], []>} : vector<8x8xf32>, vector<8x256xf32>, vector<8x256xf32> -> vector<8x256xf32>
    %cst_103 = arith.constant dense<0.000000e+00> : vector<8x256xf32>
    %145 = tpu.matmul %143, %3, %cst_103 {dimension_numbers = #tpu.dot_dimension_numbers<[1], [0], [0], [1], [0, 0, 1, 1], [], []>} : vector<8x8xf32>, vector<8x256xf32>, vector<8x256xf32> -> vector<8x256xf32>
    %146 = arith.mulf %122, %144 : vector<8x256xf32>
    %147 = arith.addf %146, %145 : vector<8x256xf32>
    %c0_104 = arith.constant 0 : index
    %c0_105 = arith.constant 0 : index
    %148 = vector.load %arg4[%c0_104, %c0_105] : memref<8x8xf32, #tpu.memory_space<vmem>>, vector<8x8xf32>
    %cst_106 = arith.constant dense<0.000000e+00> : vector<8x256xf32>
    %149 = tpu.matmul %148, %1, %cst_106 {dimension_numbers = #tpu.dot_dimension_numbers<[1], [0], [0], [1], [0, 0, 1, 1], [], []>} : vector<8x8xf32>, vector<8x256xf32>, vector<8x256xf32> -> vector<8x256xf32>
    %c0_107 = arith.constant 0 : index
    %c4 = arith.constant 4 : index
    %150 = vector.load %arg5[%c0_107, %c4] : memref<8x128xf32, #tpu.memory_space<vmem>>, vector<8x1xf32>
    %c0_108 = arith.constant 0 : index
    %c5_109 = arith.constant 5 : index
    %151 = vector.load %arg5[%c0_108, %c5_109] : memref<8x128xf32, #tpu.memory_space<vmem>>, vector<8x1xf32>
    %cst_110 = arith.constant dense<0.000000e+00> : vector<8x8xf32>
    %152 = tpu.matmul %149, %2, %cst_110 {dimension_numbers = #tpu.dot_dimension_numbers<[1], [0], [0], [1], [0, 0, 1, 1], [], []>} : vector<8x256xf32>, vector<256x8xf32>, vector<8x8xf32> -> vector<8x8xf32>
    %cst_111 = arith.constant 3.906250e-03 : f32
    %153 = vector.broadcast %cst_111 : f32 to vector<8x8xf32>
    %154 = arith.mulf %152, %153 : vector<8x8xf32>
    %155 = arith.mulf %149, %149 : vector<8x256xf32>
    %cst_112 = arith.constant dense<0.000000e+00> : vector<8x8xf32>
    %156 = tpu.matmul %155, %2, %cst_112 {dimension_numbers = #tpu.dot_dimension_numbers<[1], [0], [0], [1], [0, 0, 1, 1], [], []>} : vector<8x256xf32>, vector<256x8xf32>, vector<8x8xf32> -> vector<8x8xf32>
    %cst_113 = arith.constant 3.906250e-03 : f32
    %157 = vector.broadcast %cst_113 : f32 to vector<8x8xf32>
    %158 = arith.mulf %156, %157 : vector<8x8xf32>
    %159 = arith.mulf %154, %154 : vector<8x8xf32>
    %160 = arith.subf %158, %159 : vector<8x8xf32>
    %cst_114 = arith.constant 0.000000e+00 : f32
    %161 = vector.broadcast %cst_114 : f32 to vector<8x8xf32>
    %162 = arith.maximumf %160, %161 : vector<8x8xf32>
    %cst_115 = arith.constant 9.99999974E-6 : f32
    %163 = vector.broadcast %cst_115 : f32 to vector<8x8xf32>
    %164 = arith.addf %162, %163 : vector<8x8xf32>
    %165 = math.rsqrt %164 : vector<8x8xf32>
    %166 = vector.broadcast %150 : vector<8x1xf32> to vector<8x8xf32>
    %167 = arith.mulf %165, %166 : vector<8x8xf32>
    %168 = arith.mulf %154, %167 : vector<8x8xf32>
    %169 = vector.broadcast %151 : vector<8x1xf32> to vector<8x8xf32>
    %170 = arith.subf %169, %168 : vector<8x8xf32>
    %cst_116 = arith.constant dense<0.000000e+00> : vector<8x256xf32>
    %171 = tpu.matmul %167, %3, %cst_116 {dimension_numbers = #tpu.dot_dimension_numbers<[1], [0], [0], [1], [0, 0, 1, 1], [], []>} : vector<8x8xf32>, vector<8x256xf32>, vector<8x256xf32> -> vector<8x256xf32>
    %cst_117 = arith.constant dense<0.000000e+00> : vector<8x256xf32>
    %172 = tpu.matmul %170, %3, %cst_117 {dimension_numbers = #tpu.dot_dimension_numbers<[1], [0], [0], [1], [0, 0, 1, 1], [], []>} : vector<8x8xf32>, vector<8x256xf32>, vector<8x256xf32> -> vector<8x256xf32>
    %173 = arith.mulf %149, %171 : vector<8x256xf32>
    %174 = arith.addf %173, %172 : vector<8x256xf32>
    %175 = arith.addf %147, %174 : vector<8x256xf32>
    %cst_118 = arith.constant 0.000000e+00 : f32
    %176 = vector.broadcast %cst_118 : f32 to vector<8x256xf32>
    %177 = arith.cmpf oge, %175, %176 : vector<8x256xf32>
    %cst_119 = arith.constant 0.00999999977 : f32
    %178 = vector.broadcast %cst_119 : f32 to vector<8x256xf32>
    %179 = arith.mulf %178, %175 : vector<8x256xf32>
    %180 = arith.select %177, %175, %179 : vector<8x256xi1>, vector<8x256xf32>
    %c0_120 = arith.constant 0 : index
    %c0_121 = arith.constant 0 : index
    %c0_122 = arith.constant 0 : index
    %181 = vector.load %arg9[%c0_120, %c0_121, %c0_122] : memref<1x8x256xf32, #tpu.memory_space<vmem>>, vector<1x8x256xf32>
    %182 = vector.shape_cast %181 : vector<1x8x256xf32> to vector<8x256xf32>
    %183 = vector.shape_cast %180 : vector<8x256xf32> to vector<1x8x256xf32>
    tpu.vector_store %arg9[%c0_120, %c0_121, %c0_122], %183 {strides = array<i32>} : memref<1x8x256xf32, #tpu.memory_space<vmem>>, vector<1x8x256xf32>,
    return
  }
  func.func @transform_0(%arg0: i32) -> (i32, i32, i32) {
    %c0_i32 = arith.constant 0 : i32
    %c0_i32_0 = arith.constant 0 : i32
    %c0_i32_1 = arith.constant 0 : i32
    return %arg0, %c0_i32, %c0_i32_0 : i32, i32, i32
  }
  func.func @transform_1(%arg0: i32) -> (i32, i32) {
    %c0_i32 = arith.constant 0 : i32
    %c0_i32_0 = arith.constant 0 : i32
    %c0_i32_1 = arith.constant 0 : i32
    return %c0_i32, %c0_i32_0 : i32, i32
  }
  func.func @transform_2(%arg0: i32) -> (i32, i32, i32) {
    %c0_i32 = arith.constant 0 : i32
    %c0_i32_0 = arith.constant 0 : i32
    %c0_i32_1 = arith.constant 0 : i32
    %c0_i32_2 = arith.constant 0 : i32
    return %c0_i32, %c0_i32_0, %c0_i32_1 : i32, i32, i32
  }
  func.func @transform_3(%arg0: i32) -> (i32, i32) {
    %c0_i32 = arith.constant 0 : i32
    %c0_i32_0 = arith.constant 0 : i32
    %c0_i32_1 = arith.constant 0 : i32
    return %c0_i32, %c0_i32_0 : i32, i32
  }
  func.func @transform_4(%arg0: i32) -> (i32, i32) {
    %c0_i32 = arith.constant 0 : i32
    %c0_i32_0 = arith.constant 0 : i32
    %c0_i32_1 = arith.constant 0 : i32
    return %c0_i32, %c0_i32_0 : i32, i32
  }
  func.func @transform_5(%arg0: i32) -> (i32, i32) {
    %c0_i32 = arith.constant 0 : i32
    %c0_i32_0 = arith.constant 0 : i32
    %c0_i32_1 = arith.constant 0 : i32
    return %c0_i32, %c0_i32_0 : i32, i32
  }
  func.func @transform_6(%arg0: i32) -> (i32, i32) {
    %c0_i32 = arith.constant 0 : i32
    %c0_i32_0 = arith.constant 0 : i32
    %c0_i32_1 = arith.constant 0 : i32
    return %c0_i32, %c0_i32_0 : i32, i32
  }
  func.func @transform_7(%arg0: i32) -> (i32, i32) {
    %c0_i32 = arith.constant 0 : i32
    %c0_i32_0 = arith.constant 0 : i32
    %c0_i32_1 = arith.constant 0 : i32
    return %c0_i32, %c0_i32_0 : i32, i32
  }
  func.func @transform_8(%arg0: i32) -> (i32, i32, i32) {
    %c0_i32 = arith.constant 0 : i32
    %c0_i32_0 = arith.constant 0 : i32
    %c0_i32_1 = arith.constant 0 : i32
    return %arg0, %c0_i32, %c0_i32_0 : i32, i32, i32
  }
}

</mosaic_0001>

<bundles_post_ra>
// kernel: stacked_conv_residual_block.1
= control target key start
LH: loop header
LB: loop body
LE: loop exit
PB: predicated region body
PF: predicated region fallthrough
CT: control target
= control target key end

     0   :  { %s2347_s27 = smov 0   ;;  %s3059_s0 = inlined_call_operand.vmem [shape: f32[2,8,256], index: 0, kind: input, shape index: {}]   ;;  %s3060_s1 = inlined_call_operand.vmem [shape: f32[8,72], index: 1, kind: input, shape index: {}]   ;;  %s3061_s2 = inlined_call_operand.vmem [shape: f32[1,8,72], index: 2, kind: input, shape index: {}]   ;;  %s3062_s3 = inlined_call_operand.vmem [shape: f32[8,8], index: 3, kind: input, shape index: {}]   ;;  %s3063_s4 = inlined_call_operand.vmem [shape: f32[8,128], index: 4, kind: input, shape index: {}]   ;;  %s3064_s5 = inlined_call_operand.vmem [shape: f32[16,256], index: 5, kind: input, shape index: {}]   ;;  %s3065_s6 = inlined_call_operand.vmem [shape: f32[256,8], index: 6, kind: input, shape index: {}]   ;;  %s3066_s7 = inlined_call_operand.vmem [shape: f32[8,256], index: 7, kind: input, shape index: {}]   ;;  %s3067_s8 = inlined_call_operand.vmem [shape: f32[2,8,256], index: 8, kind: output, shape index: {}]  }
   0x1 LB: > { %s1989_s28 = sadd.s32 4294967295, %s2285_s27   ;;  %p1993_p0 = scmp.ge.s32.totalorder %s2285_s27, 1  ;;  %s2285_s27 = sphi %s2347_s27, %s18_s27  }
   0x2   : > { %p262_p1 = scmp.lt.s32.totalorder %s2285_s27, 3 }
   0x4   : > { %p263_p2 = pnand %p1993_p0, %p262_p1 }
   0x5   : > { %p296_p3 = scmp.lt.s32.totalorder (!%p263_p2), %s1989_s28, 1  ;;  %s2287_s11 = smov (!%p263_p2), 112  }
   0x6   : > { %266 = sbr.rel (%p263_p2) target bundleno = 1987 (0x7c3), region = 52  ;;  %s2288_s12 = smov (!%p263_p2), 111  }
   0x7   : > { %s2289_s13 = smov (!%p263_p2), 113   ;;  %s2290_s14 = smov (!%p263_p2), 127  }
   0x8   : > { %s2291_s15 = smov (!%p263_p2), 1   ;;  %s2293_s16 = smov (!%p263_p2), 15  }
   0x9   : > { %s2294_s30 = smov (!%p263_p2), 16   ;;  %s2295_s22 = smov (!%p263_p2), 17  }
   0xb   : > { %s3069_s28 = smov (!%p296_p3, %s1989_s28), 1  ;;  %v2292_v2 = vmov 0.0   ;;  %v2399_v3 = vld [vmem:[%s3065_s6 + $0xf8] sm:$0xff]  ;;  %v2410_v5 = vld [vmem:[%s3065_s6 + $0xf0] sm:$0xff]  ;;  %v2422_v7 = vld [vmem:[%s3065_s6 + $0xe8] sm:$0xff]  ;;  %v347_v31 = vlaneseq  ;;  %vm556_vm8 = vcmask 588800  }
   0xc   : > { %s2023_s29 = sshll.u32 %s3069_s28, 4  ;;  %624 = vmatprep.mubr.f32.mxu0 %v2292_v2  ;;  %v2404_v4 = vld [vmem:[%s3065_s6 + $0x78] sm:$0xff]  ;;  %2025 = vmatprep.subr.mxu1 %v2399_v3  ;;  %v2416_v6 = vld [vmem:[%s3065_s6 + $0x70] sm:$0xff]  ;;  %v2431_v8 = vld [vmem:[%s3065_s6 + $0x68] sm:$0xff]  ;;  %vm793_vm9 = vcmask 64512  }
   0xd   : > { %s2363_s10 = scalar_lea.vmem %s3059_s0, %s2023_s29  ;;  %2026 = vmatpush3.msra.mxu1 %v2404_v4  ;;  %v2438_v9 = vld [vmem:[%s3065_s6 + $0xe0] sm:$0xff]  ;;  %v2453_v11 = vld [vmem:[%s3065_s6 + $0xd8] sm:$0xff]  ;;  %v2465_v13 = vld [vmem:[%s3065_s6 + $0xd0] sm:$0xff]  ;;  %v355_v32 = vshrl.u32 %v347_v31, 7  ;;  %v2572_v33 = vand.u32 127, %v347_v31  ;;  %s305_s21 = scalar_lea.vmem %s3067_s8, %s2023_s29 }
   0xe   : > { %v2366_v0 = vld [vmem:[%s2363_s10] sm:$0xff]  ;;  %v2373_v1 = vld [vmem:[%s2363_s10 + $0x8] sm:$0xff]  ;;  %2027 = vmatprep.subr.mxu1 %v2410_v5  ;;  %v2459_v12 = vld [vmem:[%s3065_s6 + $0x58] sm:$0xff] }
   0xf   : > { %490 = vrot.lane.b32.xlu1 %v2366_v0, %s2287_s11  ;;  %514 = vrot.lane.b32.xlu0 %v2366_v0, %s2288_s12  ;;  %v2444_v10 = vld [vmem:[%s3065_s6 + $0x60] sm:$0xff]  ;;  %v2471_v14 = vld [vmem:[%s3065_s6 + $0x50] sm:$0xff]  ;;  %v2574_v34 = vsub.s32 0, %v355_v32  ;;  %v2576_v35 = vsub.s32 1, %v355_v32  ;;  %vm494_vm0 = vcmp.lt.s32.totalorder %v2572_v33, 112  ;;  %vm518_vm1 = vcmp.lt.s32.totalorder %v2572_v33, 111 }
  0x10   : > { %2028 = vmatpush3.msra.mxu1 %v2416_v6  ;;  %v2477_v15 = vld [vmem:[%s3065_s6 + $0xc8] sm:$0xff]  ;;  %v2489_v17 = vld [vmem:[%s3065_s6 + $0xc0] sm:$0xff]  ;;  %v2501_v19 = vld [vmem:[%s3065_s6 + $0xb8] sm:$0xff]  ;;  %vm470_vm2 = vcmp.lt.s32.totalorder %v2572_v33, 113  ;;  %vm446_vm3 = vcmp.lt.s32.totalorder %v2572_v33, 127  ;;  %vm420_vm4 = vcmp.lt.s32.totalorder %v2572_v33, 1 }
  0x11   : > { %2029 = vmatprep.subr.mxu1 %v2422_v7  ;;  %v2483_v16 = vld [vmem:[%s3065_s6 + $0x48] sm:$0xff]  ;;  %v2495_v18 = vld [vmem:[%s3065_s6 + $0x40] sm:$0xff]  ;;  %v2507_v20 = vld [vmem:[%s3065_s6 + $0x38] sm:$0xff]  ;;  %vm396_vm5 = vcmp.lt.s32.totalorder %v2572_v33, 15  ;;  %vm372_vm6 = vcmp.lt.s32.totalorder %v2572_v33, 16  ;;  %vm349_vm7 = vcmp.lt.s32.totalorder %v2572_v33, 17 }
  0x12   : > { %2030 = vmatpush3.msra.mxu1 %v2431_v8  ;;  %v2513_v21 = vld [vmem:[%s3065_s6 + $0xb0] sm:$0xff]  ;;  %v2525_v23 = vld [vmem:[%s3065_s6 + $0xa8] sm:$0xff]  ;;  %v2537_v25 = vld [vmem:[%s3065_s6 + $0xa0] sm:$0xff]  ;;  %v2298_v33 = vmov 2  }
  0x13   : > { %492 = vrot.lane.b32.xlu1 %v2373_v1, %s2287_s11  ;;  %516 = vrot.lane.b32.xlu0 %v2373_v1, %s2288_s12  ;;  %v2519_v22 = vld [vmem:[%s3065_s6 + $0x30] sm:$0xff]  ;;  %v2531_v24 = vld [vmem:[%s3065_s6 + $0x28] sm:$0xff] }
  0x14   : > { %2031 = vmatprep.subr.mxu1 %v2438_v9  ;;  %v2543_v26 = vld [vmem:[%s3065_s6 + $0x20] sm:$0xff]  ;;  %v2549_v27 = vld [vmem:[%s3065_s6 + $0x98] sm:$0xff]  ;;  %v2561_v29 = vld [vmem:[%s3065_s6 + $0x90] sm:$0xff] }
  0x15   : > { %2032 = vmatpush3.msra.mxu1 %v2444_v10  ;;  %v2555_v28 = vld [vmem:[%s3065_s6 + $0x18] sm:$0xff]  ;;  %v2567_v30 = vld [vmem:[%s3065_s6 + $0x10] sm:$0xff]  ;;  %v2003_v39 = vld [vmem:[%s3064_s5 + $0x7] ss:$8 sm:$0x3] }
  0x16   : > { %2033 = vmatprep.subr.mxu1 %v2453_v11  ;;  %v2004_v36 = vld [vmem:[%s3064_s5 + $0x10] ss:$8 sm:$0x3]  ;;  %v2002_v41 = vld [vmem:[%s3064_s5 + $0x6] ss:$8 sm:$0x3]  ;;  %v503_v43 = vrot.slane %v2003_v39, %v2574_v34  ;;  %v507_v44 = vrot.slane %v2003_v39, %v2576_v35 }
  0x17   : > { %468 = vrot.lane.b32.xlu1 %v2373_v1, %s2289_s13  ;;  %466 = vrot.lane.b32.xlu0 %v2366_v0, %s2289_s13  ;;  %v531_v40 = vrot.slane %v2004_v36, %v2576_v35  ;;  %v527_v42 = vrot.slane %v2004_v36, %v2574_v34  ;;  %v479_v50 = vrot.slane %v2002_v41, %v2574_v34  ;;  %v2001_v55 = vld [vmem:[%s3064_s5 + $0x5] ss:$8 sm:$0x3]  ;;  %v2000_v36 = vld [vmem:[%s3064_s5 + $0x3] ss:$8 sm:$0x3] }
  0x18   : > { %2034 = vmatpush3.msra.mxu1 %v2459_v12  ;;  %v483_v53 = vrot.slane %v2002_v41, %v2576_v35  ;;  %v455_v31 = vrot.slane %v2001_v55, %v2574_v34  ;;  %v459_v32 = vrot.slane %v2001_v55, %v2576_v35 }
  0x19   : > { %2035 = vmatprep.subr.mxu1 %v2465_v13 }
  0x1a   : > { %2036 = vmatpush3.msra.mxu1 %v2471_v14 }
  0x1b   : > { %444 = vrot.lane.b32.xlu1 %v2373_v1, %s2290_s14  ;;  %442 = vrot.lane.b32.xlu0 %v2366_v0, %s2290_s14 }
  0x1c   : > { %2037 = vmatprep.subr.mxu1 %v2477_v15 }
  0x1d   : > { %2038 = vmatpush3.msra.mxu1 %v2483_v16 }
  0x1e   : > { %2039 = vmatprep.subr.mxu1 %v2489_v17 }
  0x1f   : > { %418 = vrot.lane.b32.xlu1 %v2373_v1, %s2291_s15  ;;  %416 = vrot.lane.b32.xlu0 %v2366_v0, %s2291_s15 }
  0x20   : > { %2040 = vmatpush3.msra.mxu1 %v2495_v18 }
  0x21   : > { %2041 = vmatprep.subr.mxu1 %v2501_v19 }
  0x22   : > { %2042 = vmatpush3.msra.mxu1 %v2507_v20 }
  0x23   : > { %394 = vrot.lane.b32.xlu1 %v2373_v1, %s2293_s16  ;;  %392 = vrot.lane.b32.xlu0 %v2366_v0, %s2293_s16 }
  0x24   : > { %2043 = vmatprep.subr.mxu1 %v2513_v21 }
  0x25   : > { %2044 = vmatpush3.msra.mxu1 %v2519_v22 }
  0x26   : > { %2045 = vmatprep.subr.mxu1 %v2525_v23 }
  0x27   : > { %370 = vrot.lane.b32.xlu1 %v2373_v1, %s2294_s30  ;;  %368 = vrot.lane.b32.xlu0 %v2366_v0, %s2294_s30 }
  0x28   : > { %2046 = vmatpush3.msra.mxu1 %v2531_v24 }
  0x29   : > { %2047 = vmatprep.subr.mxu1 %v2537_v25 }
  0x2a   : > { %2048 = vmatpush3.msra.mxu1 %v2543_v26 }
  0x2b   : > { %345 = vrot.lane.b32.xlu1 %v2373_v1, %s2295_s22  ;;  %343 = vrot.lane.b32.xlu0 %v2366_v0, %s2295_s22 }
  0x2c   : > { %2049 = vmatprep.subr.mxu1 %v2549_v27 }
  0x2d   : > { %2050 = vmatpush3.msra.mxu1 %v2555_v28 }
  0x2e   : > { %2051 = vmatprep.subr.mxu1 %v2561_v29 }
  0x2f   : > { %2052 = vmatpush3.msra.mxu1 %v2567_v30 }
  0x81   : > { %v491_v37 = vpop.permute.xlu1 %490  ;;  %v515_v38 = vpop.permute.xlu0 %514 }
  0x85   : > { %v493_v45 = vpop.permute.xlu1 %492  ;;  %v517_v46 = vpop.permute.xlu0 %516 }
  0x86   : > { %v496_v47 = vsel %vm494_vm0, %v493_v45, %v491_v37  ;;  %v519_v48 = vsel %vm518_vm1, %v515_v38, %v517_v46  ;;  %v520_v49 = vsel %vm518_vm1, %v517_v46, %v515_v38  ;;  %v495_v51 = vsel %vm494_vm0, %v491_v37, %v493_v45  ;;  %v1999_v45 = vld [vmem:[%s3064_s5 + $0x2] ss:$8 sm:$0x3] }
  0x87   : > { %v535_v52 = vmul.f32 %v531_v40, %v520_v49  ;;  %v534_v54 = vmul.f32 %v527_v42, %v519_v48  ;;  %v511_v56 = vmul.f32 %v507_v44, %v496_v47  ;;  %v510_v59 = vmul.f32 %v503_v43, %v495_v51 }
  0x88   : > { %v429_v43 = vrot.slane %v2000_v36, %v2574_v34  ;;  %v433_v44 = vrot.slane %v2000_v36, %v2576_v35 }
  0x89   : > { %v469_v57 = vpop.permute.xlu1 %468  ;;  %574 = vmatprep.subr.mxu0 %v535_v52  ;;  %v467_v58 = vpop.permute.xlu0 %466  ;;  %v405_v52 = vrot.slane %v1999_v45, %v2574_v34 }
  0x8a   : > { %v471_v60 = vsel %vm470_vm2, %v467_v58, %v469_v57  ;;  %v472_v61 = vsel %vm470_vm2, %v469_v57, %v467_v58  ;;  %575 = vmatpush1.msra.mxu0 %v534_v54  ;;  %v1998_v54 = vld [vmem:[%s3064_s5 + $0x1] ss:$8 sm:$0x3] }
  0x8b   : > { %v486_v62 = vmul.f32 %v479_v50, %v471_v60  ;;  %v487_v63 = vmul.f32 %v483_v53, %v472_v61  ;;  %576 = vmatprep.subr.mxu0 %v511_v56  ;;  %v409_v53 = vrot.slane %v1999_v45, %v2576_v35  ;;  %v385_v60 = vrot.slane %v1998_v54, %v2576_v35  ;;  %v352_v61 = vld [vmem:[%s3064_s5] ss:$8 sm:$0x3] }
  0x8c   : > { %577 = vmatpush1.msra.mxu0 %v510_v59 }
  0x8d   : > { %v445_v37 = vpop.permute.xlu1 %444  ;;  %578 = vmatprep.subr.mxu0 %v487_v63  ;;  %v443_v38 = vpop.permute.xlu0 %442 }
  0x8e   : > { %v447_v39 = vsel %vm446_vm3, %v443_v38, %v445_v37  ;;  %v448_v40 = vsel %vm446_vm3, %v445_v37, %v443_v38  ;;  %579 = vmatpush1.msra.mxu0 %v486_v62  ;;  %v357_v38 = vrot.slane %v352_v61, %v2574_v34 }
  0x8f   : > { %v462_v41 = vmul.f32 %v455_v31, %v447_v39  ;;  %v463_v42 = vmul.f32 %v459_v32, %v448_v40  ;;  %v361_v39 = vrot.slane %v352_v61, %v2576_v35 }
  0x91   : > { %v419_v46 = vpop.permute.xlu1 %418  ;;  %580 = vmatprep.subr.mxu0 %v463_v42  ;;  %v417_v47 = vpop.permute.xlu0 %416 }
  0x92   : > { %v421_v48 = vsel %vm420_vm4, %v417_v47, %v419_v46  ;;  %v422_v49 = vsel %vm420_vm4, %v419_v46, %v417_v47  ;;  %581 = vmatpush1.msra.mxu0 %v462_v41  ;;  %v342_v46 = vld [vmem:[%s3060_s1] sm:$0xff]  ;;  %v2695_v47 = vld [vmem:[%s3065_s6 + $0x88] sm:$0xff] }
  0x93   : > { %v436_v50 = vmul.f32 %v429_v43, %v422_v49  ;;  %v437_v51 = vmul.f32 %v433_v44, %v421_v48  ;;  %582 = vmatprep.subr.mxu0 %v2373_v1  ;;  %2053 = vmatprep.subr.mxu1 %v2695_v47  ;;  %v2701_v48 = vld [vmem:[%s3065_s6 + $0x8] sm:$0xff]  ;;  %v2708_v49 = vld [vmem:[%s3065_s6 + $0x80] sm:$0xff] }
  0x94   : > { %583 = vmatpush1.msra.mxu0 %v2366_v0  ;;  %v381_v0 = vrot.slane %v1998_v54, %v2574_v34  ;;  %2054 = vmatpush3.msra.mxu1 %v2701_v48 }
  0x95   : > { %v395_v55 = vpop.permute.xlu1 %394  ;;  %584 = vmatprep.subr.mxu0 %v437_v51  ;;  %v393_v56 = vpop.permute.xlu0 %392  ;;  %2055 = vmatprep.subr.mxu1 %v2708_v49  ;;  %v2724_v51 = vld [vmem:[%s3063_s4] sm:$0xff] }
  0x96   : > { %v397_v57 = vsel %vm396_vm5, %v393_v56, %v395_v55  ;;  %v398_v58 = vsel %vm396_vm5, %v395_v55, %v393_v56  ;;  %585 = vmatpush1.msra.mxu0 %v436_v50  ;;  %v2715_v50 = vld [vmem:[%s3065_s6] sm:$0xff] }
  0x97   : > { %v412_v1 = vmul.f32 %v405_v52, %v398_v58  ;;  %v413_v59 = vmul.f32 %v409_v53, %v397_v57  ;;  %2056 = vmatpush3.msra.mxu1 %v2715_v50  ;;  %v2296_v52 = vmov 0   ;;  %v2297_v53 = vmov 1   ;;  %v2773_v58 = vld [vmem:[%s3066_s7 + $0x8] sm:$0xff] }
  0x98   : > { %2258 = vset.pattern.permute.xlu0 %v2296_v52  ;;  %2259 = vset.pattern.permute.xlu1 %v2297_v53 }
  0x99   : > { %v371_v62 = vpop.permute.xlu1 %370  ;;  %586 = vmatprep.subr.mxu0 %v413_v59  ;;  %v369_v63 = vpop.permute.xlu0 %368  ;;  %783 = vperm.xlu0 %2258, %v2724_v51  }
  0x9a   : > { %v373_v31 = vsel %vm372_vm6, %v369_v63, %v371_v62  ;;  %v374_v32 = vsel %vm372_vm6, %v371_v62, %v369_v63  ;;  %587 = vmatpush1.msra.mxu0 %v412_v1  ;;  %789 = vperm.xlu1 %2259, %v2724_v51   ;;  %v2778_v1 = vld [vmem:[%s3066_s7] sm:$0xff] }
  0x9b   : > { %v388_v36 = vmul.f32 %v381_v0, %v374_v32  ;;  %v389_v37 = vmul.f32 %v385_v60, %v373_v31  ;;  %827 = vmatprep.subr.mxu1 %v2773_v58 }
  0x9d   : > { %v346_v40 = vpop.permute.xlu1 %345  ;;  %588 = vmatprep.subr.mxu0 %v389_v37  ;;  %v344_v41 = vpop.permute.xlu0 %343 }
  0x9e   : > { %v350_v42 = vsel %vm349_vm7, %v344_v41, %v346_v40  ;;  %v351_v43 = vsel %vm349_vm7, %v346_v40, %v344_v41  ;;  %589 = vmatpush1.msra.mxu0 %v388_v36  ;;  %2260 = vset.pattern.permute.xlu1 %v2298_v33 }
  0x9f   : > { %v364_v44 = vmul.f32 %v357_v38, %v351_v43  ;;  %v365_v45 = vmul.f32 %v361_v39, %v350_v42 }
  0xa1   : > { %590 = vmatprep.subr.mxu0 %v365_v45 }
  0xa2   : > { %591 = vmatpush1.msra.mxu0 %v364_v44 }
  0xa3   : > { %2005 = vmatmul.mubr.msk.f32.vlgmr.msra.gmra.mxu0 %vm556_vm8, %v342_v46  ;;  %2060 = vmatprep.subr.mxu0 %v2399_v3 }
  0xa4   : > { %2061 = vmatpush3.msra.mxu0 %v2404_v4 }
  0xa5   : > { %2062 = vmatprep.subr.mxu0 %v2410_v5 }
  0xa6   : > { %2063 = vmatpush3.msra.mxu0 %v2416_v6 }
  0xa7   : > { %2064 = vmatprep.subr.mxu0 %v2422_v7 }
  0xa8   : > { %2065 = vmatpush3.msra.mxu0 %v2431_v8 }
  0xa9   : > { %2066 = vmatprep.subr.mxu0 %v2438_v9 }
  0xaa   : > { %2067 = vmatpush3.msra.mxu0 %v2444_v10 }
  0xab   : > { %2068 = vmatprep.subr.mxu0 %v2453_v11 }
  0xac   : > { %2069 = vmatpush3.msra.mxu0 %v2459_v12 }
  0xad   : > { %2070 = vmatprep.subr.mxu0 %v2465_v13 }
  0xae   : > { %2071 = vmatpush3.msra.mxu0 %v2471_v14 }
  0xaf   : > { %2072 = vmatprep.subr.mxu0 %v2477_v15 }
  0xb0   : > { %2073 = vmatpush3.msra.mxu0 %v2483_v16 }
  0xb1   : > { %2074 = vmatprep.subr.mxu0 %v2489_v17 }
  0xb2   : > { %2075 = vmatpush3.msra.mxu0 %v2495_v18 }
  0xb3   : > { %2076 = vmatprep.subr.mxu0 %v2501_v19 }
  0xb4   : > { %2077 = vmatpush3.msra.mxu0 %v2507_v20 }
  0xb5   : > { %2078 = vmatprep.subr.mxu0 %v2513_v21 }
  0xb6   : > { %2079 = vmatpush3.msra.mxu0 %v2519_v22 }
  0xb7   : > { %2080 = vmatprep.subr.mxu0 %v2525_v23 }
  0xb8   : > { %2081 = vmatpush3.msra.mxu0 %v2531_v24 }
  0xb9   : > { %2082 = vmatprep.subr.mxu0 %v2537_v25 }
  0xba   : > { %2083 = vmatpush3.msra.mxu0 %v2543_v26 }
  0xbb   : > { %2084 = vmatprep.subr.mxu0 %v2549_v27 }
  0xbc   : > { %2085 = vmatpush3.msra.mxu0 %v2555_v28 }
  0xbd   : > { %2086 = vmatprep.subr.mxu0 %v2561_v29 }
  0xbe   : > { %2087 = vmatpush3.msra.mxu0 %v2567_v30 }
  0xbf   : > { %2088 = vmatprep.subr.mxu0 %v2695_v47 }
  0xc0   : > { %2089 = vmatpush3.msra.mxu0 %v2701_v48 }
  0xc1   : > { %2090 = vmatprep.subr.mxu0 %v2708_v49 }
  0xc2   : > { %2091 = vmatpush3.msra.mxu0 %v2715_v50 }
  0xc3   : > { %2095 = vmatprep.subr.mxu0 %v2399_v3 }
 0x114   : > { %v784_v40 = vpop.permute.xlu0 %783 }
 0x115   : > { %v790_v43 = vpop.permute.xlu1 %789 }
 0x163   : > { %v2728_v54 = vpop.f32.mrf.mxu0 }
 0x164   : > { %v703_v57 = vmul.f32 %v2728_v54, %v2728_v54 }
 0x165   : > { %v2730_v55 = vpop.f32.mrf.mxu0 }
 0x166   : > { %v704_v56 = vmul.f32 %v2730_v55, %v2730_v55  ;;  %696 = vmatprep.mubr.f32.mxu1 %v2730_v55 }
 0x167   : > { %697 = vmatmul.mubr.f32.vlgmr.msra.gmra.mxu1 %v2728_v54 }
 0x168   : > { %769 = vmatprep.mubr.f32.mxu0 %v704_v56  ;;  %861 = vmatprep.mubr.f32.mxu1 %v2292_v2 }
 0x169   : > { %770 = vmatmul.mubr.f32.vlgmr.msra.gmra.mxu0 %v703_v57  ;;  %828 = vmatpush1.msra.mxu1 %v2778_v1 }
 0x16a   : > { %2096 = vmatpush3.msra.mxu0 %v2404_v4  ;;  %901 = vmatprep.subr.mxu1 %v2773_v58 }
 0x16b   : > { %2097 = vmatprep.subr.mxu0 %v2410_v5 }
 0x16c   : > { %2098 = vmatpush3.msra.mxu0 %v2416_v6 }
 0x16d   : > { %2099 = vmatprep.subr.mxu0 %v2422_v7 }
 0x16e   : > { %2100 = vmatpush3.msra.mxu0 %v2431_v8 }
 0x16f   : > { %2101 = vmatprep.subr.mxu0 %v2438_v9 }
 0x170   : > { %2102 = vmatpush3.msra.mxu0 %v2444_v10 }
 0x171   : > { %2103 = vmatprep.subr.mxu0 %v2453_v11 }
 0x172   : > { %2104 = vmatpush3.msra.mxu0 %v2459_v12 }
 0x173   : > { %2105 = vmatprep.subr.mxu0 %v2465_v13 }
 0x174   : > { %2106 = vmatpush3.msra.mxu0 %v2471_v14 }
 0x175   : > { %2107 = vmatprep.subr.mxu0 %v2477_v15 }
 0x176   : > { %2108 = vmatpush3.msra.mxu0 %v2483_v16 }
 0x177   : > { %2109 = vmatprep.subr.mxu0 %v2489_v17 }
 0x178   : > { %2110 = vmatpush3.msra.mxu0 %v2495_v18 }
 0x179   : > { %2111 = vmatprep.subr.mxu0 %v2501_v19 }
 0x17a   : > { %2112 = vmatpush3.msra.mxu0 %v2507_v20 }
 0x17b   : > { %2113 = vmatprep.subr.mxu0 %v2513_v21 }
 0x17c   : > { %2114 = vmatpush3.msra.mxu0 %v2519_v22 }
 0x17d   : > { %2115 = vmatprep.subr.mxu0 %v2525_v23 }
 0x17e   : > { %2116 = vmatpush3.msra.mxu0 %v2531_v24 }
 0x17f   : > { %2117 = vmatprep.subr.mxu0 %v2537_v25 }
 0x180   : > { %2118 = vmatpush3.msra.mxu0 %v2543_v26 }
 0x181   : > { %2119 = vmatprep.subr.mxu0 %v2549_v27 }
 0x182   : > { %2120 = vmatpush3.msra.mxu0 %v2555_v28 }
 0x183   : > { %2121 = vmatprep.subr.mxu0 %v2561_v29 }
 0x184   : > { %2122 = vmatpush3.msra.mxu0 %v2567_v30 }
 0x185   : > { %2123 = vmatprep.subr.mxu0 %v2695_v47 }
 0x186   : > { %2124 = vmatpush3.msra.mxu0 %v2701_v48 }
 0x187   : > { %2125 = vmatprep.subr.mxu0 %v2708_v49 }
 0x188   : > { %2126 = vmatpush3.msra.mxu0 %v2715_v50 }
 0x189   : > { %1418 = vmatprep.subr.mxu0 %v2773_v58 }
 0x227   : > { %v2057_v59 = vpop.f32.mrf.mxu1 }
 0x229   : > { %v2058_v0 = vpop.f32.mrf.mxu1  ;;  %v2092_v60 = vpop.f32.mrf.mxu0 }
 0x22a   : > { %v2059_v61 = vadd.f32 %v2058_v0, %v2057_v59 }
 0x22b   : > { %v2093_v62 = vpop.f32.mrf.mxu0 }
 0x22c   : > { %v702_v63 = vmul.f32 0.00390625, %v2059_v61  ;;  %v2094_v31 = vadd.f32 %v2093_v62, %v2092_v60 }
 0x22e   : > { %v776_v32 = vmul.f32 %v702_v63, %v702_v63  ;;  %v775_v36 = vmul.f32 0.00390625, %v2094_v31 }
 0x230   : > { %v777_v37 = vsub.f32 %v775_v36, %v776_v32 }
 0x232   : > { %v778_v38 = vmax.f32 %v777_v37, 0.0  ;;  %v2013_v37 = vld [vmem:[%s3064_s5 + $0x7] ss:$8 sm:$0x3] }
 0x234   : > { %v779_v39 = vadd.f32 1e-05, %v778_v38 }
 0x236   : > { %2265 = vrsqrt.f32 %v779_v39 }
 0x243   : > { %v2266_v41 = vpop.eup %2265 }
 0x244   : > { %v786_v42 = vmul.f32 %v2266_v41, %v784_v40 }
 0x246   : > { %2006 = vmatmul.mubr.msk.f32.vlgmr.msra.gmra.mxu1 %vm793_vm9, %v786_v42  ;;  %v787_v44 = vmul.f32 %v786_v42, %v702_v63 }
 0x247   : > { %902 = vmatpush1.msra.mxu1 %v2778_v1  ;;  %935 = vmatprep.mubr.f32.mxu1 %v2292_v2 }
 0x248   : > { %v792_v45 = vsub.f32 %v790_v43, %v787_v44  ;;  %v1098_v44 = vrot.slane %v2013_v37, %v2574_v34 }
 0x24a   : > { %2007 = vmatmul.mubr.msk.f32.vlgmr.msra.gmra.mxu1 %vm793_vm9, %v792_v45  ;;  %v1102_v45 = vrot.slane %v2013_v37, %v2576_v35 }
 0x24b   : > { %1216 = vmatprep.mubr.f32.mxu1 %v2292_v2 }
 0x306   : > { %v863_v46 = vpop.f32.mrf.mxu1 }
 0x307   : > { %v942_v53 = vmul.f32 %v863_v46, %v2728_v54  ;;  %v2014_v54 = vld [vmem:[%s3064_s5 + $0x10] ss:$8 sm:$0x3]  ;;  %v2012_v46 = vld [vmem:[%s3064_s5 + $0x6] ss:$8 sm:$0x3] }
 0x308   : > { %v865_v52 = vpop.f32.mrf.mxu1  ;;  %v1120_v32 = vrot.slane %v2014_v54, %v2574_v34  ;;  %v1124_v36 = vrot.slane %v2014_v54, %v2576_v35 }
 0x309   : > { %v943_v57 = vmul.f32 %v865_v52, %v2730_v55 }
 0x30a   : > { %v937_v56 = vpop.f32.mrf.mxu1 }
 0x30b   : > { %v944_v59 = vadd.f32 %v942_v53, %v937_v56 }
 0x30c   : > { %v939_v0 = vpop.f32.mrf.mxu1 }
 0x30d   : > { %vm946_vm10 = vcmp.ge.f32.partialorder %v944_v59, 0.0  ;;  %v948_v60 = vmul.f32 0.01, %v944_v59  ;;  %v945_v61 = vadd.f32 %v943_v57, %v939_v0 }
 0x30f   : > { %v2791_v62 = vsel %vm946_vm10, %v944_v59, %v948_v60  ;;  %vm947_vm11 = vcmp.ge.f32.partialorder %v945_v61, 0.0  ;;  %v949_v63 = vmul.f32 0.01, %v945_v61  ;;  %v1076_v60 = vrot.slane %v2012_v46, %v2574_v34 }
 0x310   : > { %1109 = vrot.lane.b32.xlu1 %v2791_v62, %s2288_s12 }
 0x311   : > { %v2795_v31 = vsel %vm947_vm11, %v945_v61, %v949_v63  ;;  %v1080_v61 = vrot.slane %v2012_v46, %v2576_v35  ;;  %v2011_v63 = vld [vmem:[%s3064_s5 + $0x5] ss:$8 sm:$0x3] }
 0x312   : > { %1111 = vrot.lane.b32.xlu0 %v2795_v31, %s2288_s12 }
 0x314   : > { %1087 = vrot.lane.b32.xlu1 %v2791_v62, %s2287_s11 }
 0x316   : > { %1089 = vrot.lane.b32.xlu0 %v2795_v31, %s2287_s11 }
 0x318   : > { %1065 = vrot.lane.b32.xlu1 %v2791_v62, %s2289_s13 }
 0x31a   : > { %1067 = vrot.lane.b32.xlu0 %v2795_v31, %s2289_s13 }
 0x31c   : > { %1043 = vrot.lane.b32.xlu1 %v2791_v62, %s2290_s14 }
 0x31e   : > { %1045 = vrot.lane.b32.xlu0 %v2795_v31, %s2290_s14 }
 0x320   : > { %1019 = vrot.lane.b32.xlu1 %v2791_v62, %s2291_s15 }
 0x322   : > { %1021 = vrot.lane.b32.xlu0 %v2795_v31, %s2291_s15 }
 0x324   : > { %997 = vrot.lane.b32.xlu1 %v2791_v62, %s2293_s16 }
 0x326   : > { %999 = vrot.lane.b32.xlu0 %v2795_v31, %s2293_s16 }
 0x328   : > { %975 = vrot.lane.b32.xlu1 %v2791_v62, %s2294_s30 }
 0x32a   : > { %977 = vrot.lane.b32.xlu0 %v2795_v31, %s2294_s30 }
 0x32c   : > { %953 = vrot.lane.b32.xlu1 %v2791_v62, %s2295_s22 }
 0x32e   : > { %955 = vrot.lane.b32.xlu0 %v2795_v31, %s2295_s22 }
 0x330   : > { %1375 = vperm.xlu1 %2260, %v2724_v51  }
 0x382   : > { %v1110_v55 = vpop.permute.xlu1 %1109 }
 0x384   : > { %v1112_v38 = vpop.permute.xlu0 %1111 }
 0x385   : > { %v1113_v39 = vsel %vm518_vm1, %v1110_v55, %v1112_v38  ;;  %v1114_v40 = vsel %vm518_vm1, %v1112_v38, %v1110_v55 }
 0x386   : > { %v1127_v41 = vmul.f32 %v1120_v32, %v1113_v39  ;;  %v1128_v42 = vmul.f32 %v1124_v36, %v1114_v40  ;;  %v1088_v43 = vpop.permute.xlu1 %1087  ;;  %v1054_v39 = vrot.slane %v2011_v63, %v2574_v34  ;;  %v1058_v40 = vrot.slane %v2011_v63, %v2576_v35 }
 0x388   : > { %1166 = vmatprep.subr.mxu1 %v1128_v42  ;;  %v1090_v52 = vpop.permute.xlu0 %1089 }
 0x389   : > { %v1091_v53 = vsel %vm494_vm0, %v1088_v43, %v1090_v52  ;;  %v1092_v56 = vsel %vm494_vm0, %v1090_v52, %v1088_v43  ;;  %1167 = vmatpush1.msra.mxu1 %v1127_v41  ;;  %v2010_v41 = vld [vmem:[%s3064_s5 + $0x3] ss:$8 sm:$0x3] }
 0x38a   : > { %v1105_v57 = vmul.f32 %v1098_v44, %v1091_v53  ;;  %v1106_v59 = vmul.f32 %v1102_v45, %v1092_v56  ;;  %v1066_v0 = vpop.permute.xlu1 %1065  ;;  %v1030_v53 = vrot.slane %v2010_v41, %v2574_v34  ;;  %v1034_v56 = vrot.slane %v2010_v41, %v2576_v35 }
 0x38c   : > { %1168 = vmatprep.subr.mxu1 %v1106_v59  ;;  %v1068_v54 = vpop.permute.xlu0 %1067 }
 0x38d   : > { %v1069_v55 = vsel %vm470_vm2, %v1066_v0, %v1068_v54  ;;  %v1070_v32 = vsel %vm470_vm2, %v1068_v54, %v1066_v0  ;;  %1169 = vmatpush1.msra.mxu1 %v1105_v57  ;;  %v2009_v57 = vld [vmem:[%s3064_s5 + $0x2] ss:$8 sm:$0x3] }
 0x38e   : > { %v1083_v36 = vmul.f32 %v1076_v60, %v1069_v55  ;;  %v1084_v37 = vmul.f32 %v1080_v61, %v1070_v32  ;;  %v1044_v38 = vpop.permute.xlu1 %1043  ;;  %v1008_v55 = vrot.slane %v2009_v57, %v2574_v34  ;;  %v1012_v32 = vrot.slane %v2009_v57, %v2576_v35 }
 0x390   : > { %1170 = vmatprep.subr.mxu1 %v1084_v37  ;;  %v1046_v42 = vpop.permute.xlu0 %1045 }
 0x391   : > { %v1047_v43 = vsel %vm446_vm3, %v1044_v38, %v1046_v42  ;;  %v1048_v44 = vsel %vm446_vm3, %v1046_v42, %v1044_v38  ;;  %1171 = vmatpush1.msra.mxu1 %v1083_v36  ;;  %v2008_v36 = vld [vmem:[%s3064_s5 + $0x1] ss:$8 sm:$0x3] }
 0x392   : > { %v1061_v45 = vmul.f32 %v1054_v39, %v1047_v43  ;;  %v1062_v46 = vmul.f32 %v1058_v40, %v1048_v44  ;;  %v1020_v52 = vpop.permute.xlu1 %1019  ;;  %v986_v42 = vrot.slane %v2008_v36, %v2574_v34  ;;  %v959_v43 = vld [vmem:[%s3064_s5] ss:$8 sm:$0x3] }
 0x393   : > { %v968_v57 = vrot.slane %v959_v43, %v2576_v35 }
 0x394   : > { %1172 = vmatprep.subr.mxu1 %v1062_v46  ;;  %v1022_v59 = vpop.permute.xlu0 %1021 }
 0x395   : > { %v1023_v0 = vsel %vm420_vm4, %v1020_v52, %v1022_v59  ;;  %v1024_v60 = vsel %vm420_vm4, %v1022_v59, %v1020_v52  ;;  %1173 = vmatpush1.msra.mxu1 %v1061_v45 }
 0x396   : > { %v1037_v61 = vmul.f32 %v1030_v53, %v1024_v60  ;;  %v1038_v63 = vmul.f32 %v1034_v56, %v1023_v0  ;;  %v998_v54 = vpop.permute.xlu1 %997  ;;  %1174 = vmatprep.subr.mxu1 %v2795_v31  ;;  %v964_v56 = vrot.slane %v959_v43, %v2574_v34  ;;  %v2299_v34 = vmov 3  }
 0x397   : > { %1175 = vmatpush1.msra.mxu1 %v2791_v62  ;;  %v990_v62 = vrot.slane %v2008_v36, %v2576_v35  ;;  %2261 = vset.pattern.permute.xlu0 %v2299_v34 }
 0x398   : > { %1176 = vmatprep.subr.mxu1 %v1038_v63  ;;  %v1000_v37 = vpop.permute.xlu0 %999  ;;  %1381 = vperm.xlu0 %2261, %v2724_v51  }
 0x399   : > { %v1001_v38 = vsel %vm396_vm5, %v998_v54, %v1000_v37  ;;  %v1002_v39 = vsel %vm396_vm5, %v1000_v37, %v998_v54  ;;  %1177 = vmatpush1.msra.mxu1 %v1037_v61 }
 0x39a   : > { %v1015_v31 = vmul.f32 %v1008_v55, %v1002_v39  ;;  %v1016_v40 = vmul.f32 %v1012_v32, %v1001_v38  ;;  %v976_v41 = vpop.permute.xlu1 %975  ;;  %v952_v55 = vld [vmem:[%s3061_s2] sm:$0xff] }
 0x39c   : > { %1178 = vmatprep.subr.mxu1 %v1016_v40  ;;  %v978_v44 = vpop.permute.xlu0 %977 }
 0x39d   : > { %v979_v45 = vsel %vm372_vm6, %v976_v41, %v978_v44  ;;  %v980_v46 = vsel %vm372_vm6, %v978_v44, %v976_v41  ;;  %1179 = vmatpush1.msra.mxu1 %v1015_v31 }
 0x39e   : > { %v993_v52 = vmul.f32 %v986_v42, %v980_v46  ;;  %v994_v53 = vmul.f32 %v990_v62, %v979_v45  ;;  %v954_v59 = vpop.permute.xlu1 %953 }
 0x3a0   : > { %1180 = vmatprep.subr.mxu1 %v994_v53  ;;  %v956_v0 = vpop.permute.xlu0 %955  ;;  %v2271_v53 = vld [vmem:[%s2363_s10 + $0x8] sm:$0xff] }
 0x3a1   : > { %v957_v60 = vsel %vm349_vm7, %v954_v59, %v956_v0  ;;  %v958_v61 = vsel %vm349_vm7, %v956_v0, %v954_v59  ;;  %1181 = vmatpush1.msra.mxu1 %v993_v52  ;;  %v2273_v59 = vld [vmem:[%s3065_s6 + $0xf8] sm:$0xff] }
 0x3a2   : > { %v971_v63 = vmul.f32 %v964_v56, %v958_v61  ;;  %v972_v54 = vmul.f32 %v968_v57, %v957_v60  ;;  %v2272_v56 = vld [vmem:[%s2363_s10] sm:$0xff]  ;;  %v2274_v0 = vld [vmem:[%s3065_s6 + $0x78] sm:$0xff]  ;;  %v2275_v60 = vld [vmem:[%s3065_s6 + $0xf0] sm:$0xff] }
 0x3a3   : > { %v1537_v57 = vld [vmem:[%s3062_s3] sm:$0xff]  ;;  %v2276_v61 = vld [vmem:[%s3065_s6 + $0x70] sm:$0xff] }
 0x3a4   : > { %1182 = vmatprep.subr.mxu1 %v972_v54  ;;  %v2278_v54 = vld [vmem:[%s3065_s6 + $0x68] sm:$0xff] }
 0x3a5   : > { %1183 = vmatpush1.msra.mxu1 %v971_v63  ;;  %v2277_v63 = vld [vmem:[%s3065_s6 + $0xe8] sm:$0xff] }
 0x3a6   : > { %2015 = vmatmul.mubr.msk.f32.vlgmr.msra.gmra.mxu1 %vm556_vm8, %v952_v55  ;;  %2130 = vmatprep.subr.mxu1 %v2399_v3 }
 0x3a7   : > { %2131 = vmatpush3.msra.mxu1 %v2404_v4 }
 0x3a8   : > { %2132 = vmatprep.subr.mxu1 %v2410_v5 }
 0x3a9   : > { %2133 = vmatpush3.msra.mxu1 %v2416_v6 }
 0x3aa   : > { %2134 = vmatprep.subr.mxu1 %v2422_v7 }
 0x3ab   : > { %2135 = vmatpush3.msra.mxu1 %v2431_v8  ;;  %v1376_v62 = vpop.permute.xlu1 %1375 }
 0x3ac   : > { %2136 = vmatprep.subr.mxu1 %v2438_v9 }
 0x3ad   : > { %2137 = vmatpush3.msra.mxu1 %v2444_v10 }
 0x3ae   : > { %2138 = vmatprep.subr.mxu1 %v2453_v11 }
 0x3af   : > { %2139 = vmatpush3.msra.mxu1 %v2459_v12 }
 0x3b0   : > { %2140 = vmatprep.subr.mxu1 %v2465_v13 }
 0x3b1   : > { %2141 = vmatpush3.msra.mxu1 %v2471_v14 }
 0x3b2   : > { %2142 = vmatprep.subr.mxu1 %v2477_v15 }
 0x3b3   : > { %2143 = vmatpush3.msra.mxu1 %v2483_v16 }
 0x3b4   : > { %2144 = vmatprep.subr.mxu1 %v2489_v17 }
 0x3b5   : > { %2145 = vmatpush3.msra.mxu1 %v2495_v18 }
 0x3b6   : > { %2146 = vmatprep.subr.mxu1 %v2501_v19 }
 0x3b7   : > { %2147 = vmatpush3.msra.mxu1 %v2507_v20 }
 0x3b8   : > { %2148 = vmatprep.subr.mxu1 %v2513_v21 }
 0x3b9   : > { %2149 = vmatpush3.msra.mxu1 %v2519_v22 }
 0x3ba   : > { %2150 = vmatprep.subr.mxu1 %v2525_v23 }
 0x3bb   : > { %2151 = vmatpush3.msra.mxu1 %v2531_v24 }
 0x3bc   : > { %2152 = vmatprep.subr.mxu1 %v2537_v25 }
 0x3bd   : > { %2153 = vmatpush3.msra.mxu1 %v2543_v26 }
 0x3be   : > { %2154 = vmatprep.subr.mxu1 %v2549_v27 }
 0x3bf   : > { %2155 = vmatpush3.msra.mxu1 %v2555_v28 }
 0x3c0   : > { %2156 = vmatprep.subr.mxu1 %v2561_v29 }
 0x3c1   : > { %2157 = vmatpush3.msra.mxu1 %v2567_v30 }
 0x3c2   : > { %2158 = vmatprep.subr.mxu1 %v2695_v47 }
 0x3c3   : > { %2159 = vmatpush3.msra.mxu1 %v2701_v48 }
 0x3c4   : > { %2160 = vmatprep.subr.mxu1 %v2708_v49 }
 0x3c5   : > { %2161 = vmatpush3.msra.mxu1 %v2715_v50 }
 0x3c6   : > { %2165 = vmatprep.subr.mxu1 %v2399_v3 }
 0x413   : > { %v1382_v45 = vpop.permute.xlu0 %1381 }
 0x466   : > { %v2940_v35 = vpop.f32.mrf.mxu1 }
 0x467   : > { %v1295_v3 = vmul.f32 %v2940_v35, %v2940_v35 }
 0x468   : > { %v2942_v32 = vpop.f32.mrf.mxu1 }
 0x469   : > { %v1296_v36 = vmul.f32 %v2942_v32, %v2942_v32  ;;  %1288 = vmatprep.mubr.f32.mxu0 %v2942_v32 }
 0x46a   : > { %1289 = vmatmul.mubr.f32.vlgmr.msra.gmra.mxu0 %v2940_v35 }
 0x46b   : > { %1361 = vmatprep.mubr.f32.mxu1 %v1296_v36  ;;  %1419 = vmatpush1.msra.mxu0 %v2778_v1 }
 0x46c   : > { %1362 = vmatmul.mubr.f32.vlgmr.msra.gmra.mxu1 %v1295_v3  ;;  %1452 = vmatprep.mubr.f32.mxu0 %v2292_v2 }
 0x46d   : > { %1492 = vmatprep.subr.mxu0 %v2773_v58  ;;  %2166 = vmatpush3.msra.mxu1 %v2404_v4 }
 0x46e   : > { %2167 = vmatprep.subr.mxu1 %v2410_v5 }
 0x46f   : > { %2168 = vmatpush3.msra.mxu1 %v2416_v6 }
 0x470   : > { %2169 = vmatprep.subr.mxu1 %v2422_v7 }
 0x471   : > { %2170 = vmatpush3.msra.mxu1 %v2431_v8 }
 0x472   : > { %2171 = vmatprep.subr.mxu1 %v2438_v9 }
 0x473   : > { %2172 = vmatpush3.msra.mxu1 %v2444_v10 }
 0x474   : > { %2173 = vmatprep.subr.mxu1 %v2453_v11 }
 0x475   : > { %2174 = vmatpush3.msra.mxu1 %v2459_v12 }
 0x476   : > { %2175 = vmatprep.subr.mxu1 %v2465_v13 }
 0x477   : > { %2176 = vmatpush3.msra.mxu1 %v2471_v14 }
 0x478   : > { %2177 = vmatprep.subr.mxu1 %v2477_v15 }
 0x479   : > { %2178 = vmatpush3.msra.mxu1 %v2483_v16 }
 0x47a   : > { %2179 = vmatprep.subr.mxu1 %v2489_v17 }
 0x47b   : > { %2180 = vmatpush3.msra.mxu1 %v2495_v18 }
 0x47c   : > { %2181 = vmatprep.subr.mxu1 %v2501_v19 }
 0x47d   : > { %2182 = vmatpush3.msra.mxu1 %v2507_v20 }
 0x47e   : > { %2183 = vmatprep.subr.mxu1 %v2513_v21 }
 0x47f   : > { %2184 = vmatpush3.msra.mxu1 %v2519_v22 }
 0x480   : > { %2185 = vmatprep.subr.mxu1 %v2525_v23 }
 0x481   : > { %2186 = vmatpush3.msra.mxu1 %v2531_v24 }
 0x482   : > { %2187 = vmatprep.subr.mxu1 %v2537_v25 }
 0x483   : > { %2188 = vmatpush3.msra.mxu1 %v2543_v26 }
 0x484   : > { %2189 = vmatprep.subr.mxu1 %v2549_v27 }
 0x485   : > { %2190 = vmatpush3.msra.mxu1 %v2555_v28 }
 0x486   : > { %2191 = vmatprep.subr.mxu1 %v2561_v29 }
 0x487   : > { %2192 = vmatpush3.msra.mxu1 %v2567_v30 }
 0x488   : > { %2193 = vmatprep.subr.mxu1 %v2695_v47 }
 0x489   : > { %2194 = vmatpush3.msra.mxu1 %v2701_v48 }
 0x48a   : > { %2195 = vmatprep.subr.mxu1 %v2708_v49 }
 0x48b   : > { %2196 = vmatpush3.msra.mxu1 %v2715_v50 }
 0x48c   : > { %1805 = vmatprep.subr.mxu1 %v2773_v58 }
 0x52a   : > { %v2127_v4 = vpop.f32.mrf.mxu0 }
 0x52c   : > { %v2128_v5 = vpop.f32.mrf.mxu0  ;;  %v2162_v6 = vpop.f32.mrf.mxu1 }
 0x52d   : > { %v2129_v7 = vadd.f32 %v2128_v5, %v2127_v4 }
 0x52e   : > { %v2163_v8 = vpop.f32.mrf.mxu1 }
 0x52f   : > { %v1294_v37 = vmul.f32 0.00390625, %v2129_v7  ;;  %v2164_v38 = vadd.f32 %v2163_v8, %v2162_v6 }
 0x531   : > { %v1368_v39 = vmul.f32 %v1294_v37, %v1294_v37  ;;  %v1367_v31 = vmul.f32 0.00390625, %v2164_v38 }
 0x533   : > { %v1369_v40 = vsub.f32 %v1367_v31, %v1368_v39 }
 0x535   : > { %v1370_v41 = vmax.f32 %v1369_v40, 0.0 }
 0x537   : > { %v1371_v42 = vadd.f32 1e-05, %v1370_v41 }
 0x539   : > { %2267 = vrsqrt.f32 %v1371_v42 }
 0x546   : > { %v2268_v43 = vpop.eup %2267 }
 0x547   : > { %v1378_v44 = vmul.f32 %v2268_v43, %v1376_v62 }
 0x549   : > { %2016 = vmatmul.mubr.msk.f32.vlgmr.msra.gmra.mxu0 %vm793_vm9, %v1378_v44  ;;  %v1379_v46 = vmul.f32 %v1378_v44, %v1294_v37 }
 0x54a   : > { %1493 = vmatpush1.msra.mxu0 %v2778_v1  ;;  %1526 = vmatprep.mubr.f32.mxu0 %v2292_v2 }
 0x54b   : > { %v1384_v52 = vsub.f32 %v1382_v45, %v1379_v46  ;;  %1571 = vmatprep.subr.mxu0 %v2271_v53 }
 0x54d   : > { %2017 = vmatmul.mubr.msk.f32.vlgmr.msra.gmra.mxu0 %vm793_vm9, %v1384_v52 }
 0x54e   : > { %1572 = vmatpush1.msra.mxu0 %v2272_v56  ;;  %1605 = vmatprep.mubr.f32.mxu0 %v2292_v2 }
 0x54f   : > { %2200 = vmatprep.subr.mxu0 %v2273_v59 }
 0x551   : > { %2018 = vmatmul.mubr.msk.f32.vlgmr.msra.gmra.mxu0 %vm793_vm9, %v1537_v57 }
 0x552   : > { %2201 = vmatpush3.msra.mxu0 %v2274_v0 }
 0x553   : > { %2202 = vmatprep.subr.mxu0 %v2275_v60 }
 0x554   : > { %2203 = vmatpush3.msra.mxu0 %v2276_v61 }
 0x555   : > { %2204 = vmatprep.subr.mxu0 %v2277_v63 }
 0x556   : > { %2205 = vmatpush3.msra.mxu0 %v2278_v54 }
 0x557   : > { %2206 = vmatprep.subr.mxu0 %v2438_v9  ;;  %v2300_v9 = vmov 4  }
 0x558   : > { %2207 = vmatpush3.msra.mxu0 %v2444_v10  ;;  %2262 = vset.pattern.permute.xlu1 %v2300_v9  ;;  %v2301_v10 = vmov 5  }
 0x559   : > { %2208 = vmatprep.subr.mxu0 %v2453_v11  ;;  %2264 = vset.pattern.permute.xlu0 %v2301_v10 }
 0x55a   : > { %2209 = vmatpush3.msra.mxu0 %v2459_v12  ;;  %1762 = vperm.xlu1 %2262, %v2724_v51  }
 0x55b   : > { %2210 = vmatprep.subr.mxu0 %v2465_v13 }
 0x55c   : > { %2211 = vmatpush3.msra.mxu0 %v2471_v14 }
 0x55d   : > { %2212 = vmatprep.subr.mxu0 %v2477_v15 }
 0x55e   : > { %2213 = vmatpush3.msra.mxu0 %v2483_v16  ;;  %2263 = vset.pattern.permute.xlu1 %v2301_v10 }
 0x55f   : > { %2214 = vmatprep.subr.mxu0 %v2489_v17  ;;  %1768 = vperm.xlu1 %2263, %v2724_v51  }
 0x560   : > { %2215 = vmatpush3.msra.mxu0 %v2495_v18 }
 0x561   : > { %2216 = vmatprep.subr.mxu0 %v2501_v19 }
 0x562   : > { %2217 = vmatpush3.msra.mxu0 %v2507_v20 }
 0x563   : > { %2218 = vmatprep.subr.mxu0 %v2513_v21 }
 0x564   : > { %2219 = vmatpush3.msra.mxu0 %v2519_v22 }
 0x565   : > { %2220 = vmatprep.subr.mxu0 %v2525_v23 }
 0x566   : > { %2221 = vmatpush3.msra.mxu0 %v2531_v24 }
 0x567   : > { %2222 = vmatprep.subr.mxu0 %v2537_v25 }
 0x568   : > { %2223 = vmatpush3.msra.mxu0 %v2543_v26 }
 0x569   : > { %2224 = vmatprep.subr.mxu0 %v2549_v27 }
 0x56a   : > { %2225 = vmatpush3.msra.mxu0 %v2555_v28 }
 0x56b   : > { %2226 = vmatprep.subr.mxu0 %v2561_v29 }
 0x56c   : > { %2227 = vmatpush3.msra.mxu0 %v2567_v30 }
 0x56d   : > { %2228 = vmatprep.subr.mxu0 %v2695_v47 }
 0x56e   : > { %2229 = vmatpush3.msra.mxu0 %v2701_v48 }
 0x56f   : > { %2230 = vmatprep.subr.mxu0 %v2708_v49 }
 0x570   : > { %2231 = vmatpush3.msra.mxu0 %v2715_v50 }
 0x571   : > { %1879 = vmatprep.subr.mxu0 %v2773_v58 }
 0x5d5   : > { %v1763_v51 = vpop.permute.xlu1 %1762 }
 0x609   : > { %v1454_v11 = vpop.f32.mrf.mxu0 }
 0x60a   : > { %v1533_v13 = vmul.f32 %v1454_v11, %v2940_v35 }
 0x60b   : > { %v1456_v12 = vpop.f32.mrf.mxu0 }
 0x60c   : > { %v1534_v15 = vmul.f32 %v1456_v12, %v2942_v32 }
 0x60d   : > { %v1528_v14 = vpop.f32.mrf.mxu0 }
 0x60e   : > { %v1535_v16 = vadd.f32 %v1533_v13, %v1528_v14 }
 0x60f   : > { %v1530_v17 = vpop.f32.mrf.mxu0 }
 0x610   : > { %v1536_v18 = vadd.f32 %v1534_v15, %v1530_v17 }
 0x611   : > { %v1607_v19 = vpop.f32.mrf.mxu0 }
 0x612   : > { %v1683_v22 = vmul.f32 %v1607_v19, %v1607_v19 }
 0x613   : > { %v1609_v20 = vpop.f32.mrf.mxu0 }
 0x614   : > { %v1684_v21 = vmul.f32 %v1609_v20, %v1609_v20  ;;  %1676 = vmatprep.mubr.f32.mxu1 %v1609_v20 }
 0x615   : > { %1677 = vmatmul.mubr.f32.vlgmr.msra.gmra.mxu1 %v1607_v19 }
 0x616   : > { %1749 = vmatprep.mubr.f32.mxu0 %v1684_v21  ;;  %1806 = vmatpush1.msra.mxu1 %v2778_v1 }
 0x617   : > { %1750 = vmatmul.mubr.f32.vlgmr.msra.gmra.mxu0 %v1683_v22  ;;  %1839 = vmatprep.mubr.f32.mxu1 %v2292_v2 }
 0x618   : > { %1880 = vmatpush1.msra.mxu0 %v2778_v1  ;;  %1913 = vmatprep.mubr.f32.mxu0 %v2292_v2  ;;  %v1769_v1 = vpop.permute.xlu1 %1768 }
 0x6d5   : > { %v2197_v23 = vpop.f32.mrf.mxu1 }
 0x6d7   : > { %v2198_v24 = vpop.f32.mrf.mxu1  ;;  %v2232_v25 = vpop.f32.mrf.mxu0 }
 0x6d8   : > { %v2199_v26 = vadd.f32 %v2198_v24, %v2197_v23 }
 0x6d9   : > { %v2233_v27 = vpop.f32.mrf.mxu0 }
 0x6da   : > { %v1682_v28 = vmul.f32 0.00390625, %v2199_v26  ;;  %v2234_v29 = vadd.f32 %v2233_v27, %v2232_v25 }
 0x6dc   : > { %v1756_v30 = vmul.f32 %v1682_v28, %v1682_v28  ;;  %v1755_v47 = vmul.f32 0.00390625, %v2234_v29 }
 0x6de   : > { %v1757_v48 = vsub.f32 %v1755_v47, %v1756_v30 }
 0x6e0   : > { %v1758_v49 = vmax.f32 %v1757_v48, 0.0 }
 0x6e2   : > { %v1759_v50 = vadd.f32 1e-05, %v1758_v49 }
 0x6e4   : > { %2269 = vrsqrt.f32 %v1759_v50 }
 0x6f1   : > { %v2270_v58 = vpop.eup %2269 }
 0x6f2   : > { %v1765_v55 = vmul.f32 %v2270_v58, %v1763_v51 }
 0x6f4   : > { %2019 = vmatmul.mubr.msk.f32.vlgmr.msra.gmra.mxu1 %vm793_vm9, %v1765_v55  ;;  %v1766_v2 = vmul.f32 %v1765_v55, %v1682_v28 }
 0x6f6   : > { %v1771_v33 = vsub.f32 %v1769_v1, %v1766_v2 }
 0x6f8   : > { %2020 = vmatmul.mubr.msk.f32.vlgmr.msra.gmra.mxu0 %vm793_vm9, %v1771_v33 }
 0x7b4   : > { %v1841_v34 = vpop.f32.mrf.mxu1 }
 0x7b5   : > { %v1920_v32 = vmul.f32 %v1841_v34, %v1607_v19 }
 0x7b6   : > { %v1843_v35 = vpop.f32.mrf.mxu1 }
 0x7b7   : > { %v1921_v3 = vmul.f32 %v1843_v35, %v1609_v20 }
 0x7b8   : > { %v1915_v36 = vpop.f32.mrf.mxu0 }
 0x7b9   : > { %v1922_v4 = vadd.f32 %v1920_v32, %v1915_v36 }
 0x7ba   : > { %v1917_v5 = vpop.f32.mrf.mxu0 }
 0x7bb   : > { %v1924_v6 = vadd.f32 %v1922_v4, %v1535_v16  ;;  %v1923_v7 = vadd.f32 %v1921_v3, %v1917_v5 }
 0x7bd   : > { %vm1926_vm12 = vcmp.ge.f32.partialorder %v1924_v6, 0.0  ;;  %v1928_v8 = vmul.f32 0.01, %v1924_v6  ;;  %v1925_v37 = vadd.f32 %v1923_v7, %v1536_v18 }
 0x7bf   : > { %v1930_v38 = vsel %vm1926_vm12, %v1924_v6, %v1928_v8  ;;  %vm1927_vm13 = vcmp.ge.f32.partialorder %v1925_v37, 0.0  ;;  %v1929_v39 = vmul.f32 0.01, %v1925_v37 }
 0x7c0   : > { %1932 = vst [vmem:[%s305_s21] sm:$0xff] %v1930_v38 }
 0x7c1   : > { %v1931_v31 = vsel %vm1927_vm13, %v1925_v37, %v1929_v39 }
 0x7c2   : > { %1933 = vst [vmem:[%s305_s21 + $0x8] sm:$0xff] %v1931_v31 }
 0x7c3 PF: > { %s18_s27 = sadd.s32 1, %s2285_s27  }
 0x7c4   : > { %p15_p4 = scmp.ge.s32.totalorder %s18_s27, 4  }
 0x7c6   :  { %17 = sbr.rel (!%p15_p4) target bundleno = 1 (0x1), region = 89 }

</bundles_post_ra>
